<compile_context>
chip_gen: v7x
topology: tpu7x:2x2x1
jax: 0.10.0
libtpu: 0.0.40
codegen_flags: <defaults>
</compile_context>

<pallas_src>
import functools

import jax
import jax.numpy as jnp
from jax import lax
from jax.experimental import pallas as pl
from jax.experimental.pallas import tpu as pltpu


# ----------------------------------------------------------------------------
# Small helpers
# ----------------------------------------------------------------------------
def _round_up(n, m):
    return ((n + m - 1) // m) * m


def _full_spec(shape):
    zeros = (0,) * len(shape)
    return pl.BlockSpec(shape, lambda i: zeros)


def _leaky(x):
    return jnp.where(x >= 0.0, x, 0.01 * x)


def _maxpool_nhwc(x, ph, pw):
    # Non-overlapping MaxPool2d (stride == kernel) as cheap fused XLA glue.
    # TODO(synk): only stride == kernel supported; fuse into the kernel prologue.
    B, H, W, C = x.shape
    return x.reshape(B, H // ph, ph, W // pw, pw, C).max(axis=(2, 4))


# ----------------------------------------------------------------------------
# Fused Pallas kernel: conv1 + BN + LeakyReLU -> DynamicConv2D (conv + BN +
# LeakyReLU + attention scale), whole batch in one grid step.
# ----------------------------------------------------------------------------
def _make_fused_kernel(B, OH, OW, Cin, F, LC, COp, has_lc):
    R = OH * OW
    inv_r = 1.0 / float(R)

    def kernel(*refs):
        if has_lc:
            (xp_ref, lc_ref, w1_ref, b1_ref, w2_ref, b2_ref,
             wa1_ref, ba1_ref, wa2_ref, ba2_ref, o_ref) = refs
        else:
            (xp_ref, w1_ref, b1_ref, w2_ref, b2_ref,
             wa1_ref, ba1_ref, wa2_ref, ba2_ref, o_ref) = refs

        xp = xp_ref[...]                                   # (B, OH+2, OW+2, Cin) f32
        w1 = w1_ref[...]                                   # (9, Cin, F) f32, BN folded

        # ---- conv1: 9 accumulating MXU dots over shifted slabs of padded x ----
        acc1 = jnp.zeros((B * R, F), jnp.float32)
        tap = 0
        for dy in range(3):
            for dx in range(3):
                slab = xp[:, dy:dy + OH, dx:dx + OW, :].reshape(B * R, Cin)
                acc1 = acc1 + jnp.dot(slab, w1[tap],
                                      preferred_element_type=jnp.float32)
                tap += 1
        y1 = _leaky(acc1 + b1_ref[...])                    # (B*R, F)

        # ---- zero-pad conv1 output (value-level pad; stays in VMEM/vregs) ----
        y1_4d = y1.reshape(B, OH, OW, F)
        zw = jnp.zeros((B, OH, 1, F), jnp.float32)
        zh = jnp.zeros((B, 1, OW + 2, F), jnp.float32)
        c1pad = jnp.concatenate(
            [zh, jnp.concatenate([zw, y1_4d, zw], axis=2), zh], axis=1)

        # ---- q = concat([conv1, maxpool2(last_conv)], channels), built once ----
        if has_lc:
            q_pad = jnp.concatenate([c1pad, lc_ref[...]], axis=-1)
        else:
            q_pad = c1pad                                  # (B, OH+2, OW+2, P)
        P = q_pad.shape[-1]

        # ---- DynamicConv2D attention scale:
        #      sum_k softmax(dense2(leaky(dense1(avgpool(q))))/0.7)  (== 1 in math,
        #      because the same conv is reused for every branch; kept for fidelity)
        pooled = jnp.sum(jnp.sum(q_pad, axis=1), axis=1) * inv_r       # (B, P)
        h = _leaky(jnp.dot(pooled, wa1_ref[...],
                           preferred_element_type=jnp.float32) + ba1_ref[...])
        logits = (jnp.dot(h, wa2_ref[...],
                          preferred_element_type=jnp.float32) + ba2_ref[...]) / 0.7
        logits = logits - jnp.max(logits, axis=-1, keepdims=True)
        e = jnp.exp(logits)
        att = e / jnp.sum(e, axis=-1, keepdims=True)
        att_sum = jnp.sum(att, axis=-1, keepdims=True)                 # (B, 1)

        # ---- DynamicConv2D conv: 9 accumulating dots; out channels padded to a
        #      multiple of 128 lanes so the final stores are unmasked/lane-dense.
        acc2 = jnp.zeros((B * R, COp), jnp.float32)
        w2 = w2_ref[...]                                   # (9, P, COp) f32, BN folded
        tap = 0
        for dy in range(3):
            for dx in range(3):
                slab = q_pad[:, dy:dy + OH, dx:dx + OW, :].reshape(B * R, P)
                acc2 = acc2 + jnp.dot(slab, w2[tap],
                                      preferred_element_type=jnp.float32)
                tap += 1
        y2 = _leaky(acc2 + b2_ref[...])                    # (B*R, COp)
        y2 = y2.reshape(B, R, COp) * att_sum.reshape(B, 1, 1)
        o_ref[...] = y2

    return kernel


# ----------------------------------------------------------------------------
# Module forward (host-side wrapper)
# ----------------------------------------------------------------------------
def scale_block_forward(params, x_nchw, last_conv_nchw=None, *,
                        enter=False, pool=(2, 2)):
    """Scale_Block forward (eval-mode BN folded into per-channel scale/shift)."""
    x = jnp.transpose(x_nchw, (0, 2, 3, 1)).astype(jnp.float32)   # NCHW -> NHWC
    if not enter:
        x = _maxpool_nhwc(x, pool[0], pool[1])                    # maxpool1
    B, OH, OW, Cin = x.shape
    xpad = jnp.pad(x, ((0, 0), (1, 1), (1, 1), (0, 0)))

    c = params["conv"]
    d = params["dyn"]["conv"]
    a = params["dyn"]["att"]
    F = c["w"].shape[-1]
    CO = d["w"].shape[-1]
    P = d["w"].shape[-2]
    COp = _round_up(CO, 128)                                      # lane-dense N

    # Fold eval-mode BN scale into conv weights; taps-major (9, Cin, Cout).
    w1 = (c["w"] * c["scale"].reshape(1, 1, 1, -1)).reshape(9, Cin, F)
    b1 = c["shift"]                                               # (1, F)
    w2 = (d["w"] * d["scale"].reshape(1, 1, 1, -1)).reshape(9, P, CO)
    w2 = jnp.pad(w2, ((0, 0), (0, 0), (0, COp - CO)))
    b2 = jnp.pad(d["shift"], ((0, 0), (0, COp - CO)))             # (1, COp)

    if not enter:
        lc = jnp.transpose(last_conv_nchw, (0, 2, 3, 1)).astype(jnp.float32)
        lc = _maxpool_nhwc(lc, 2, 2)                              # maxpool2
        lcpad = jnp.pad(lc, ((0, 0), (1, 1), (1, 1), (0, 0)))
        LC = lc.shape[-1]
        assert P == F + LC, (P, F, LC)
        operands = [xpad, lcpad, w1, b1, w2, b2,
                    a["w1"], a["b1"], a["w2"], a["b2"]]
    else:
        LC = 0
        assert P == F, (P, F)
        operands = [xpad, w1, b1, w2, b2,
                    a["w1"], a["b1"], a["w2"], a["b2"]]

    R = OH * OW
    kernel = _make_fused_kernel(B, OH, OW, Cin, F, LC, COp, has_lc=(not enter))
    out = pl.pallas_call(
        kernel,
        out_shape=jax.ShapeDtypeStruct((B, R, COp), jnp.float32),
        grid=(1,),                         # batch folded into M; single grid step
        in_specs=[_full_spec(op.shape) for op in operands],
        out_specs=_full_spec((B, R, COp)),
        compiler_params=pltpu.CompilerParams(
            dimension_semantics=("arbitrary",)),
    )(*operands)

    out = out[:, :, :CO].reshape(B, OH, OW, CO)                   # drop lane padding
    return jnp.transpose(out, (0, 3, 1, 2))                       # NHWC -> NCHW


# ----------------------------------------------------------------------------
# Deterministic parameter initialization (eval-mode BN folded)
# ----------------------------------------------------------------------------
def _init_conv_bn(key, cin, cout):
    # TODO(synk): BatchNorm folded with eval-mode running statistics only
    # (training-mode batch statistics are not implemented).
    kw, kb, kg, kbe, km, kv = jax.random.split(key, 6)
    w = jax.random.normal(kw, (3, 3, cin, cout), jnp.float32) * (
        1.0 / jnp.sqrt(9.0 * cin))
    bias = jax.random.normal(kb, (cout,), jnp.float32) * 0.1
    gamma = 1.0 + 0.1 * jax.random.normal(kg, (cout,), jnp.float32)
    beta = 0.1 * jax.random.normal(kbe, (cout,), jnp.float32)
    mean = 0.1 * jax.random.normal(km, (cout,), jnp.float32)
    var = 0.5 + jax.random.uniform(kv, (cout,), jnp.float32)
    scale = gamma / jnp.sqrt(var + 1e-5)
    shift = (bias - mean) * scale + beta
    return {"w": w,
            "scale": scale.reshape(1, cout),
            "shift": shift.reshape(1, cout)}


def init_params(key, input_chnl, filters, input_plane, out_plane, k):
    k1, k2, k3, k4, k5, k6 = jax.random.split(key, 6)
    att = {
        "w1": jax.random.normal(k3, (input_plane, 2 * k), jnp.float32) * (
            1.0 / jnp.sqrt(float(input_plane))),
        "b1": jax.random.normal(k4, (1, 2 * k), jnp.float32) * 0.1,
        "w2": jax.random.normal(k5, (2 * k, k), jnp.float32) * (
            1.0 / jnp.sqrt(2.0 * k)),
        "b2": jax.random.normal(k6, (1, k), jnp.float32) * 0.1,
    }
    return {"conv": _init_conv_bn(k1, input_chnl, filters),
            "dyn": {"conv": _init_conv_bn(k2, input_plane, out_plane),
                    "att": att}}


# ----------------------------------------------------------------------------
# Pure-JAX reference (for a correctness check against the fused kernel)
# ----------------------------------------------------------------------------
def _reference_forward(params, x_nchw, last_conv_nchw=None, *,
                       enter=False, pool=(2, 2)):
    x = jnp.transpose(x_nchw, (0, 2, 3, 1)).astype(jnp.float32)
    if not enter:
        x = _maxpool_nhwc(x, pool[0], pool[1])

    def conv_bn_lrelu(v, p):
        y = lax.conv_general_dilated(
            v, p["w"], (1, 1), "SAME",
            dimension_numbers=("NHWC", "HWIO", "NHWC"),
            precision=lax.Precision.HIGHEST)
        y = y * p["scale"].reshape(1, 1, 1, -1) + p["shift"].reshape(1, 1, 1, -1)
        return jnp.where(y >= 0.0, y, 0.01 * y)

    conv = conv_bn_lrelu(x, params["conv"])
    if not enter:
        lc = jnp.transpose(last_conv_nchw, (0, 2, 3, 1)).astype(jnp.float32)
        lc = _maxpool_nhwc(lc, 2, 2)
        q = jnp.concatenate([conv, lc], axis=-1)
    else:
        q = conv

    a = params["dyn"]["att"]
    pooled = jnp.mean(q, axis=(1, 2))
    h = pooled @ a["w1"] + a["b1"]
    h = jnp.where(h >= 0.0, h, 0.01 * h)
    logits = (h @ a["w2"] + a["b2"]) / 0.7
    att = jax.nn.softmax(logits, axis=-1)
    feat = conv_bn_lrelu(q, params["dyn"]["conv"])
    out = feat * jnp.sum(att, axis=-1).reshape(-1, 1, 1, 1)
    return jnp.transpose(out, (0, 3, 1, 2))


# ----------------------------------------------------------------------------
if __name__ == "__main__":
    key = jax.random.PRNGKey(0)
    kx, kl, kp = jax.random.split(key, 3)

    # Scale_Block(input_chnl=4, filters=8, input_plane=16, out_plane=16,
    #             pool_size=[2,2], pool_strides=[2,2], enter=False, k=8)
    B, Cin, H, W = 2, 4, 16, 16
    filters, last_c = 8, 8
    input_plane = filters + last_c     # channels of concat([conv, pooled last_conv])
    out_plane, k = 16, 8

    x = jax.random.normal(kx, (B, Cin, H, W), jnp.float32)
    last_conv = jax.random.normal(kl, (B, last_c, H, W), jnp.float32)
    params = init_params(kp, Cin, filters, input_plane, out_plane, k)

    fwd = jax.jit(functools.partial(scale_block_forward, enter=False, pool=(2, 2)))
    out = jax.block_until_ready(fwd(params, x, last_conv))

    assert out.shape == (B, out_plane, H // 2, W // 2), out.shape
    assert bool(jnp.all(jnp.isfinite(out)))

    ref = _reference_forward(params, x, last_conv, enter=False, pool=(2, 2))
    err = float(jnp.max(jnp.abs(out - ref)))
    tol = 5e-2 * (1.0 + float(jnp.max(jnp.abs(ref))))
    assert err < tol, f"max abs err {err} (tol {tol})"

    print("KERNEL_OK")
</pallas_src>

<mosaic_0001>
module attributes {stable_mosaic.version = 11 : i64} {
  func.func @kernel(%arg0: i32, %arg1: memref<2x10x10x4xf32, #tpu.memory_space<vmem>>, %arg2: memref<2x10x10x8xf32, #tpu.memory_space<vmem>>, %arg3: memref<9x4x8xf32, #tpu.memory_space<vmem>>, %arg4: memref<1x8xf32, #tpu.memory_space<vmem>>, %arg5: memref<9x16x128xf32, #tpu.memory_space<vmem>>, %arg6: memref<1x128xf32, #tpu.memory_space<vmem>>, %arg7: memref<16x16xf32, #tpu.memory_space<vmem>>, %arg8: memref<1x16xf32, #tpu.memory_space<vmem>>, %arg9: memref<16x8xf32, #tpu.memory_space<vmem>>, %arg10: memref<1x8xf32, #tpu.memory_space<vmem>>, %arg11: memref<2x64x128xf32, #tpu.memory_space<vmem>>) attributes {dimension_semantics = [#tpu.dimension_semantics<arbitrary>], iteration_bounds = array<i64: 1>, scalar_prefetch = 0 : i64, scratch_operands = 0 : i64, tpu.core_type = #tpu.core_type<tc>, window_params = [{pipeline_mode = #tpu.pipeline_mode<synchronous>, transform_indices = @transform_0, window_bounds = array<i64: 2, 10, 10, 4>}, {pipeline_mode = #tpu.pipeline_mode<synchronous>, transform_indices = @transform_1, window_bounds = array<i64: 2, 10, 10, 8>}, {pipeline_mode = #tpu.pipeline_mode<synchronous>, transform_indices = @transform_2, window_bounds = array<i64: 9, 4, 8>}, {pipeline_mode = #tpu.pipeline_mode<synchronous>, transform_indices = @transform_3, window_bounds = array<i64: 1, 8>}, {pipeline_mode = #tpu.pipeline_mode<synchronous>, transform_indices = @transform_4, window_bounds = array<i64: 9, 16, 128>}, {pipeline_mode = #tpu.pipeline_mode<synchronous>, transform_indices = @transform_5, window_bounds = array<i64: 1, 128>}, {pipeline_mode = #tpu.pipeline_mode<synchronous>, transform_indices = @transform_6, window_bounds = array<i64: 16, 16>}, {pipeline_mode = #tpu.pipeline_mode<synchronous>, transform_indices = @transform_7, window_bounds = array<i64: 1, 16>}, {pipeline_mode = #tpu.pipeline_mode<synchronous>, transform_indices = @transform_8, window_bounds = array<i64: 16, 8>}, {pipeline_mode = #tpu.pipeline_mode<synchronous>, transform_indices = @transform_9, window_bounds = array<i64: 1, 8>}, {pipeline_mode = #tpu.pipeline_mode<synchronous>, transform_indices = @transform_10, window_bounds = array<i64: 2, 64, 128>}]} {
    %c0 = arith.constant 0 : index
    %c0_0 = arith.constant 0 : index
    %c0_1 = arith.constant 0 : index
    %c0_2 = arith.constant 0 : index
    %0 = vector.load %arg1[%c0, %c0_0, %c0_1, %c0_2] : memref<2x10x10x4xf32, #tpu.memory_space<vmem>>, vector<2x10x10x4xf32>
    %c0_3 = arith.constant 0 : index
    %c0_4 = arith.constant 0 : index
    %c0_5 = arith.constant 0 : index
    %1 = vector.load %arg3[%c0_3, %c0_4, %c0_5] : memref<9x4x8xf32, #tpu.memory_space<vmem>>, vector<9x4x8xf32>
    %cst = arith.constant 0.000000e+00 : f32
    %2 = vector.broadcast %cst : f32 to vector<128x8xf32>
    %3 = vector.extract_strided_slice %0 {offsets = [0, 0, 0, 0], sizes = [2, 8, 8, 4], strides = [1, 1, 1, 1]} : vector<2x10x10x4xf32> to vector<2x8x8x4xf32>
    %4 = vector.shape_cast %3 : vector<2x8x8x4xf32> to vector<128x4xf32>
    %5 = vector.extract_strided_slice %1 {offsets = [0, 0, 0], sizes = [1, 4, 8], strides = [1, 1, 1]} : vector<9x4x8xf32> to vector<1x4x8xf32>
    %6 = vector.shape_cast %5 : vector<1x4x8xf32> to vector<4x8xf32>
    %cst_6 = arith.constant dense<0.000000e+00> : vector<128x8xf32>
    %7 = tpu.matmul %4, %6, %cst_6 {dimension_numbers = #tpu.dot_dimension_numbers<[1], [0], [0], [1], [0, 0, 1, 1], [], []>} : vector<128x4xf32>, vector<4x8xf32>, vector<128x8xf32> -> vector<128x8xf32>
    %8 = arith.addf %2, %7 : vector<128x8xf32>
    %9 = vector.extract_strided_slice %0 {offsets = [0, 0, 1, 0], sizes = [2, 8, 8, 4], strides = [1, 1, 1, 1]} : vector<2x10x10x4xf32> to vector<2x8x8x4xf32>
    %10 = vector.shape_cast %9 : vector<2x8x8x4xf32> to vector<128x4xf32>
    %11 = vector.extract_strided_slice %1 {offsets = [1, 0, 0], sizes = [1, 4, 8], strides = [1, 1, 1]} : vector<9x4x8xf32> to vector<1x4x8xf32>
    %12 = vector.shape_cast %11 : vector<1x4x8xf32> to vector<4x8xf32>
    %cst_7 = arith.constant dense<0.000000e+00> : vector<128x8xf32>
    %13 = tpu.matmul %10, %12, %cst_7 {dimension_numbers = #tpu.dot_dimension_numbers<[1], [0], [0], [1], [0, 0, 1, 1], [], []>} : vector<128x4xf32>, vector<4x8xf32>, vector<128x8xf32> -> vector<128x8xf32>
    %14 = arith.addf %8, %13 : vector<128x8xf32>
    %15 = vector.extract_strided_slice %0 {offsets = [0, 0, 2, 0], sizes = [2, 8, 8, 4], strides = [1, 1, 1, 1]} : vector<2x10x10x4xf32> to vector<2x8x8x4xf32>
    %16 = vector.shape_cast %15 : vector<2x8x8x4xf32> to vector<128x4xf32>
    %17 = vector.extract_strided_slice %1 {offsets = [2, 0, 0], sizes = [1, 4, 8], strides = [1, 1, 1]} : vector<9x4x8xf32> to vector<1x4x8xf32>
    %18 = vector.shape_cast %17 : vector<1x4x8xf32> to vector<4x8xf32>
    %cst_8 = arith.constant dense<0.000000e+00> : vector<128x8xf32>
    %19 = tpu.matmul %16, %18, %cst_8 {dimension_numbers = #tpu.dot_dimension_numbers<[1], [0], [0], [1], [0, 0, 1, 1], [], []>} : vector<128x4xf32>, vector<4x8xf32>, vector<128x8xf32> -> vector<128x8xf32>
    %20 = arith.addf %14, %19 : vector<128x8xf32>
    %21 = vector.extract_strided_slice %0 {offsets = [0, 1, 0, 0], sizes = [2, 8, 8, 4], strides = [1, 1, 1, 1]} : vector<2x10x10x4xf32> to vector<2x8x8x4xf32>
    %22 = vector.shape_cast %21 : vector<2x8x8x4xf32> to vector<128x4xf32>
    %23 = vector.extract_strided_slice %1 {offsets = [3, 0, 0], sizes = [1, 4, 8], strides = [1, 1, 1]} : vector<9x4x8xf32> to vector<1x4x8xf32>
    %24 = vector.shape_cast %23 : vector<1x4x8xf32> to vector<4x8xf32>
    %cst_9 = arith.constant dense<0.000000e+00> : vector<128x8xf32>
    %25 = tpu.matmul %22, %24, %cst_9 {dimension_numbers = #tpu.dot_dimension_numbers<[1], [0], [0], [1], [0, 0, 1, 1], [], []>} : vector<128x4xf32>, vector<4x8xf32>, vector<128x8xf32> -> vector<128x8xf32>
    %26 = arith.addf %20, %25 : vector<128x8xf32>
    %27 = vector.extract_strided_slice %0 {offsets = [0, 1, 1, 0], sizes = [2, 8, 8, 4], strides = [1, 1, 1, 1]} : vector<2x10x10x4xf32> to vector<2x8x8x4xf32>
    %28 = vector.shape_cast %27 : vector<2x8x8x4xf32> to vector<128x4xf32>
    %29 = vector.extract_strided_slice %1 {offsets = [4, 0, 0], sizes = [1, 4, 8], strides = [1, 1, 1]} : vector<9x4x8xf32> to vector<1x4x8xf32>
    %30 = vector.shape_cast %29 : vector<1x4x8xf32> to vector<4x8xf32>
    %cst_10 = arith.constant dense<0.000000e+00> : vector<128x8xf32>
    %31 = tpu.matmul %28, %30, %cst_10 {dimension_numbers = #tpu.dot_dimension_numbers<[1], [0], [0], [1], [0, 0, 1, 1], [], []>} : vector<128x4xf32>, vector<4x8xf32>, vector<128x8xf32> -> vector<128x8xf32>
    %32 = arith.addf %26, %31 : vector<128x8xf32>
    %33 = vector.extract_strided_slice %0 {offsets = [0, 1, 2, 0], sizes = [2, 8, 8, 4], strides = [1, 1, 1, 1]} : vector<2x10x10x4xf32> to vector<2x8x8x4xf32>
    %34 = vector.shape_cast %33 : vector<2x8x8x4xf32> to vector<128x4xf32>
    %35 = vector.extract_strided_slice %1 {offsets = [5, 0, 0], sizes = [1, 4, 8], strides = [1, 1, 1]} : vector<9x4x8xf32> to vector<1x4x8xf32>
    %36 = vector.shape_cast %35 : vector<1x4x8xf32> to vector<4x8xf32>
    %cst_11 = arith.constant dense<0.000000e+00> : vector<128x8xf32>
    %37 = tpu.matmul %34, %36, %cst_11 {dimension_numbers = #tpu.dot_dimension_numbers<[1], [0], [0], [1], [0, 0, 1, 1], [], []>} : vector<128x4xf32>, vector<4x8xf32>, vector<128x8xf32> -> vector<128x8xf32>
    %38 = arith.addf %32, %37 : vector<128x8xf32>
    %39 = vector.extract_strided_slice %0 {offsets = [0, 2, 0, 0], sizes = [2, 8, 8, 4], strides = [1, 1, 1, 1]} : vector<2x10x10x4xf32> to vector<2x8x8x4xf32>
    %40 = vector.shape_cast %39 : vector<2x8x8x4xf32> to vector<128x4xf32>
    %41 = vector.extract_strided_slice %1 {offsets = [6, 0, 0], sizes = [1, 4, 8], strides = [1, 1, 1]} : vector<9x4x8xf32> to vector<1x4x8xf32>
    %42 = vector.shape_cast %41 : vector<1x4x8xf32> to vector<4x8xf32>
    %cst_12 = arith.constant dense<0.000000e+00> : vector<128x8xf32>
    %43 = tpu.matmul %40, %42, %cst_12 {dimension_numbers = #tpu.dot_dimension_numbers<[1], [0], [0], [1], [0, 0, 1, 1], [], []>} : vector<128x4xf32>, vector<4x8xf32>, vector<128x8xf32> -> vector<128x8xf32>
    %44 = arith.addf %38, %43 : vector<128x8xf32>
    %45 = vector.extract_strided_slice %0 {offsets = [0, 2, 1, 0], sizes = [2, 8, 8, 4], strides = [1, 1, 1, 1]} : vector<2x10x10x4xf32> to vector<2x8x8x4xf32>
    %46 = vector.shape_cast %45 : vector<2x8x8x4xf32> to vector<128x4xf32>
    %47 = vector.extract_strided_slice %1 {offsets = [7, 0, 0], sizes = [1, 4, 8], strides = [1, 1, 1]} : vector<9x4x8xf32> to vector<1x4x8xf32>
    %48 = vector.shape_cast %47 : vector<1x4x8xf32> to vector<4x8xf32>
    %cst_13 = arith.constant dense<0.000000e+00> : vector<128x8xf32>
    %49 = tpu.matmul %46, %48, %cst_13 {dimension_numbers = #tpu.dot_dimension_numbers<[1], [0], [0], [1], [0, 0, 1, 1], [], []>} : vector<128x4xf32>, vector<4x8xf32>, vector<128x8xf32> -> vector<128x8xf32>
    %50 = arith.addf %44, %49 : vector<128x8xf32>
    %51 = vector.extract_strided_slice %0 {offsets = [0, 2, 2, 0], sizes = [2, 8, 8, 4], strides = [1, 1, 1, 1]} : vector<2x10x10x4xf32> to vector<2x8x8x4xf32>
    %52 = vector.shape_cast %51 : vector<2x8x8x4xf32> to vector<128x4xf32>
    %53 = vector.extract_strided_slice %1 {offsets = [8, 0, 0], sizes = [1, 4, 8], strides = [1, 1, 1]} : vector<9x4x8xf32> to vector<1x4x8xf32>
    %54 = vector.shape_cast %53 : vector<1x4x8xf32> to vector<4x8xf32>
    %cst_14 = arith.constant dense<0.000000e+00> : vector<128x8xf32>
    %55 = tpu.matmul %52, %54, %cst_14 {dimension_numbers = #tpu.dot_dimension_numbers<[1], [0], [0], [1], [0, 0, 1, 1], [], []>} : vector<128x4xf32>, vector<4x8xf32>, vector<128x8xf32> -> vector<128x8xf32>
    %56 = arith.addf %50, %55 : vector<128x8xf32>
    %c0_15 = arith.constant 0 : index
    %c0_16 = arith.constant 0 : index
    %57 = vector.load %arg4[%c0_15, %c0_16] : memref<1x8xf32, #tpu.memory_space<vmem>>, vector<1x8xf32>
    %58 = vector.broadcast %57 : vector<1x8xf32> to vector<128x8xf32>
    %59 = arith.addf %56, %58 : vector<128x8xf32>
    %cst_17 = arith.constant 0.000000e+00 : f32
    %60 = vector.broadcast %cst_17 : f32 to vector<128x8xf32>
    %61 = arith.cmpf oge, %59, %60 : vector<128x8xf32>
    %cst_18 = arith.constant 0.00999999977 : f32
    %62 = vector.broadcast %cst_18 : f32 to vector<128x8xf32>
    %63 = arith.mulf %62, %59 : vector<128x8xf32>
    %64 = arith.select %61, %59, %63 : vector<128x8xi1>, vector<128x8xf32>
    %65 = vector.shape_cast %64 : vector<128x8xf32> to vector<2x8x8x8xf32>
    %cst_19 = arith.constant 0.000000e+00 : f32
    %66 = vector.broadcast %cst_19 : f32 to vector<2x8x1x8xf32>
    %cst_20 = arith.constant 0.000000e+00 : f32
    %67 = vector.broadcast %cst_20 : f32 to vector<2x1x10x8xf32>
    %68 = tpu.concatenate %66, %65, %66 in 2 : vector<2x8x1x8xf32>, vector<2x8x8x8xf32>, vector<2x8x1x8xf32> -> vector<2x8x10x8xf32>
    %69 = tpu.concatenate %67, %68, %67 in 1 : vector<2x1x10x8xf32>, vector<2x8x10x8xf32>, vector<2x1x10x8xf32> -> vector<2x10x10x8xf32>
    %c0_21 = arith.constant 0 : index
    %c0_22 = arith.constant 0 : index
    %c0_23 = arith.constant 0 : index
    %c0_24 = arith.constant 0 : index
    %70 = vector.load %arg2[%c0_21, %c0_22, %c0_23, %c0_24] : memref<2x10x10x8xf32, #tpu.memory_space<vmem>>, vector<2x10x10x8xf32>
    %71 = tpu.concatenate %69, %70 in 3 : vector<2x10x10x8xf32>, vector<2x10x10x8xf32> -> vector<2x10x10x16xf32>
    %cst_25 = arith.constant dense<0.000000e+00> : vector<2x10x16xf32>
    %72 = vector.multi_reduction <add>, %71, %cst_25 [1] : vector<2x10x10x16xf32> to vector<2x10x16xf32>
    %cst_26 = arith.constant dense<0.000000e+00> : vector<2x16xf32>
    %73 = vector.multi_reduction <add>, %72, %cst_26 [1] : vector<2x10x16xf32> to vector<2x16xf32>
    %cst_27 = arith.constant 1.562500e-02 : f32
    %74 = vector.broadcast %cst_27 : f32 to vector<2x16xf32>
    %75 = arith.mulf %73, %74 : vector<2x16xf32>
    %c0_28 = arith.constant 0 : index
    %c0_29 = arith.constant 0 : index
    %76 = vector.load %arg7[%c0_28, %c0_29] : memref<16x16xf32, #tpu.memory_space<vmem>>, vector<16x16xf32>
    %cst_30 = arith.constant dense<0.000000e+00> : vector<2x16xf32>
    %77 = tpu.matmul %75, %76, %cst_30 {dimension_numbers = #tpu.dot_dimension_numbers<[1], [0], [0], [1], [0, 0, 1, 1], [], []>} : vector<2x16xf32>, vector<16x16xf32>, vector<2x16xf32> -> vector<2x16xf32>
    %c0_31 = arith.constant 0 : index
    %c0_32 = arith.constant 0 : index
    %78 = vector.load %arg8[%c0_31, %c0_32] : memref<1x16xf32, #tpu.memory_space<vmem>>, vector<1x16xf32>
    %79 = vector.broadcast %78 : vector<1x16xf32> to vector<2x16xf32>
    %80 = arith.addf %77, %79 : vector<2x16xf32>
    %cst_33 = arith.constant 0.000000e+00 : f32
    %81 = vector.broadcast %cst_33 : f32 to vector<2x16xf32>
    %82 = arith.cmpf oge, %80, %81 : vector<2x16xf32>
    %cst_34 = arith.constant 0.00999999977 : f32
    %83 = vector.broadcast %cst_34 : f32 to vector<2x16xf32>
    %84 = arith.mulf %83, %80 : vector<2x16xf32>
    %85 = arith.select %82, %80, %84 : vector<2x16xi1>, vector<2x16xf32>
    %c0_35 = arith.constant 0 : index
    %c0_36 = arith.constant 0 : index
    %86 = vector.load %arg9[%c0_35, %c0_36] : memref<16x8xf32, #tpu.memory_space<vmem>>, vector<16x8xf32>
    %cst_37 = arith.constant dense<0.000000e+00> : vector<2x8xf32>
    %87 = tpu.matmul %85, %86, %cst_37 {dimension_numbers = #tpu.dot_dimension_numbers<[1], [0], [0], [1], [0, 0, 1, 1], [], []>} : vector<2x16xf32>, vector<16x8xf32>, vector<2x8xf32> -> vector<2x8xf32>
    %c0_38 = arith.constant 0 : index
    %c0_39 = arith.constant 0 : index
    %88 = vector.load %arg10[%c0_38, %c0_39] : memref<1x8xf32, #tpu.memory_space<vmem>>, vector<1x8xf32>
    %89 = vector.broadcast %88 : vector<1x8xf32> to vector<2x8xf32>
    %90 = arith.addf %87, %89 : vector<2x8xf32>
    %cst_40 = arith.constant 0.699999988 : f32
    %91 = vector.broadcast %cst_40 : f32 to vector<2x8xf32>
    %92 = arith.divf %90, %91 : vector<2x8xf32>
    %cst_41 = arith.constant dense<0xFF800000> : vector<2xf32>
    %93 = vector.multi_reduction <maximumf>, %92, %cst_41 [1] : vector<2x8xf32> to vector<2xf32>
    %94 = vector.shape_cast %93 : vector<2xf32> to vector<2x1xf32>
    %95 = vector.broadcast %94 : vector<2x1xf32> to vector<2x8xf32>
    %96 = arith.subf %92, %95 : vector<2x8xf32>
    %97 = math.exp %96 : vector<2x8xf32>
    %cst_42 = arith.constant dense<0.000000e+00> : vector<2xf32>
    %98 = vector.multi_reduction <add>, %97, %cst_42 [1] : vector<2x8xf32> to vector<2xf32>
    %99 = vector.shape_cast %98 : vector<2xf32> to vector<2x1xf32>
    %100 = vector.broadcast %99 : vector<2x1xf32> to vector<2x8xf32>
    %101 = arith.divf %97, %100 : vector<2x8xf32>
    %cst_43 = arith.constant dense<0.000000e+00> : vector<2xf32>
    %102 = vector.multi_reduction <add>, %101, %cst_43 [1] : vector<2x8xf32> to vector<2xf32>
    %103 = vector.shape_cast %102 : vector<2xf32> to vector<2x1xf32>
    %cst_44 = arith.constant 0.000000e+00 : f32
    %104 = vector.broadcast %cst_44 : f32 to vector<128x128xf32>
    %c0_45 = arith.constant 0 : index
    %c0_46 = arith.constant 0 : index
    %c0_47 = arith.constant 0 : index
    %105 = vector.load %arg5[%c0_45, %c0_46, %c0_47] : memref<9x16x128xf32, #tpu.memory_space<vmem>>, vector<9x16x128xf32>
    %106 = vector.extract_strided_slice %71 {offsets = [0, 0, 0, 0], sizes = [2, 8, 8, 16], strides = [1, 1, 1, 1]} : vector<2x10x10x16xf32> to vector<2x8x8x16xf32>
    %107 = vector.shape_cast %106 : vector<2x8x8x16xf32> to vector<128x16xf32>
    %108 = vector.extract_strided_slice %105 {offsets = [0, 0, 0], sizes = [1, 16, 128], strides = [1, 1, 1]} : vector<9x16x128xf32> to vector<1x16x128xf32>
    %109 = vector.shape_cast %108 : vector<1x16x128xf32> to vector<16x128xf32>
    %cst_48 = arith.constant dense<0.000000e+00> : vector<128x128xf32>
    %110 = tpu.matmul %107, %109, %cst_48 {dimension_numbers = #tpu.dot_dimension_numbers<[1], [0], [0], [1], [0, 0, 1, 1], [], []>} : vector<128x16xf32>, vector<16x128xf32>, vector<128x128xf32> -> vector<128x128xf32>
    %111 = arith.addf %104, %110 : vector<128x128xf32>
    %112 = vector.extract_strided_slice %71 {offsets = [0, 0, 1, 0], sizes = [2, 8, 8, 16], strides = [1, 1, 1, 1]} : vector<2x10x10x16xf32> to vector<2x8x8x16xf32>
    %113 = vector.shape_cast %112 : vector<2x8x8x16xf32> to vector<128x16xf32>
    %114 = vector.extract_strided_slice %105 {offsets = [1, 0, 0], sizes = [1, 16, 128], strides = [1, 1, 1]} : vector<9x16x128xf32> to vector<1x16x128xf32>
    %115 = vector.shape_cast %114 : vector<1x16x128xf32> to vector<16x128xf32>
    %cst_49 = arith.constant dense<0.000000e+00> : vector<128x128xf32>
    %116 = tpu.matmul %113, %115, %cst_49 {dimension_numbers = #tpu.dot_dimension_numbers<[1], [0], [0], [1], [0, 0, 1, 1], [], []>} : vector<128x16xf32>, vector<16x128xf32>, vector<128x128xf32> -> vector<128x128xf32>
    %117 = arith.addf %111, %116 : vector<128x128xf32>
    %118 = vector.extract_strided_slice %71 {offsets = [0, 0, 2, 0], sizes = [2, 8, 8, 16], strides = [1, 1, 1, 1]} : vector<2x10x10x16xf32> to vector<2x8x8x16xf32>
    %119 = vector.shape_cast %118 : vector<2x8x8x16xf32> to vector<128x16xf32>
    %120 = vector.extract_strided_slice %105 {offsets = [2, 0, 0], sizes = [1, 16, 128], strides = [1, 1, 1]} : vector<9x16x128xf32> to vector<1x16x128xf32>
    %121 = vector.shape_cast %120 : vector<1x16x128xf32> to vector<16x128xf32>
    %cst_50 = arith.constant dense<0.000000e+00> : vector<128x128xf32>
    %122 = tpu.matmul %119, %121, %cst_50 {dimension_numbers = #tpu.dot_dimension_numbers<[1], [0], [0], [1], [0, 0, 1, 1], [], []>} : vector<128x16xf32>, vector<16x128xf32>, vector<128x128xf32> -> vector<128x128xf32>
    %123 = arith.addf %117, %122 : vector<128x128xf32>
    %124 = vector.extract_strided_slice %71 {offsets = [0, 1, 0, 0], sizes = [2, 8, 8, 16], strides = [1, 1, 1, 1]} : vector<2x10x10x16xf32> to vector<2x8x8x16xf32>
    %125 = vector.shape_cast %124 : vector<2x8x8x16xf32> to vector<128x16xf32>
    %126 = vector.extract_strided_slice %105 {offsets = [3, 0, 0], sizes = [1, 16, 128], strides = [1, 1, 1]} : vector<9x16x128xf32> to vector<1x16x128xf32>
    %127 = vector.shape_cast %126 : vector<1x16x128xf32> to vector<16x128xf32>
    %cst_51 = arith.constant dense<0.000000e+00> : vector<128x128xf32>
    %128 = tpu.matmul %125, %127, %cst_51 {dimension_numbers = #tpu.dot_dimension_numbers<[1], [0], [0], [1], [0, 0, 1, 1], [], []>} : vector<128x16xf32>, vector<16x128xf32>, vector<128x128xf32> -> vector<128x128xf32>
    %129 = arith.addf %123, %128 : vector<128x128xf32>
    %130 = vector.extract_strided_slice %71 {offsets = [0, 1, 1, 0], sizes = [2, 8, 8, 16], strides = [1, 1, 1, 1]} : vector<2x10x10x16xf32> to vector<2x8x8x16xf32>
    %131 = vector.shape_cast %130 : vector<2x8x8x16xf32> to vector<128x16xf32>
    %132 = vector.extract_strided_slice %105 {offsets = [4, 0, 0], sizes = [1, 16, 128], strides = [1, 1, 1]} : vector<9x16x128xf32> to vector<1x16x128xf32>
    %133 = vector.shape_cast %132 : vector<1x16x128xf32> to vector<16x128xf32>
    %cst_52 = arith.constant dense<0.000000e+00> : vector<128x128xf32>
    %134 = tpu.matmul %131, %133, %cst_52 {dimension_numbers = #tpu.dot_dimension_numbers<[1], [0], [0], [1], [0, 0, 1, 1], [], []>} : vector<128x16xf32>, vector<16x128xf32>, vector<128x128xf32> -> vector<128x128xf32>
    %135 = arith.addf %129, %134 : vector<128x128xf32>
    %136 = vector.extract_strided_slice %71 {offsets = [0, 1, 2, 0], sizes = [2, 8, 8, 16], strides = [1, 1, 1, 1]} : vector<2x10x10x16xf32> to vector<2x8x8x16xf32>
    %137 = vector.shape_cast %136 : vector<2x8x8x16xf32> to vector<128x16xf32>
    %138 = vector.extract_strided_slice %105 {offsets = [5, 0, 0], sizes = [1, 16, 128], strides = [1, 1, 1]} : vector<9x16x128xf32> to vector<1x16x128xf32>
    %139 = vector.shape_cast %138 : vector<1x16x128xf32> to vector<16x128xf32>
    %cst_53 = arith.constant dense<0.000000e+00> : vector<128x128xf32>
    %140 = tpu.matmul %137, %139, %cst_53 {dimension_numbers = #tpu.dot_dimension_numbers<[1], [0], [0], [1], [0, 0, 1, 1], [], []>} : vector<128x16xf32>, vector<16x128xf32>, vector<128x128xf32> -> vector<128x128xf32>
    %141 = arith.addf %135, %140 : vector<128x128xf32>
    %142 = vector.extract_strided_slice %71 {offsets = [0, 2, 0, 0], sizes = [2, 8, 8, 16], strides = [1, 1, 1, 1]} : vector<2x10x10x16xf32> to vector<2x8x8x16xf32>
    %143 = vector.shape_cast %142 : vector<2x8x8x16xf32> to vector<128x16xf32>
    %144 = vector.extract_strided_slice %105 {offsets = [6, 0, 0], sizes = [1, 16, 128], strides = [1, 1, 1]} : vector<9x16x128xf32> to vector<1x16x128xf32>
    %145 = vector.shape_cast %144 : vector<1x16x128xf32> to vector<16x128xf32>
    %cst_54 = arith.constant dense<0.000000e+00> : vector<128x128xf32>
    %146 = tpu.matmul %143, %145, %cst_54 {dimension_numbers = #tpu.dot_dimension_numbers<[1], [0], [0], [1], [0, 0, 1, 1], [], []>} : vector<128x16xf32>, vector<16x128xf32>, vector<128x128xf32> -> vector<128x128xf32>
    %147 = arith.addf %141, %146 : vector<128x128xf32>
    %148 = vector.extract_strided_slice %71 {offsets = [0, 2, 1, 0], sizes = [2, 8, 8, 16], strides = [1, 1, 1, 1]} : vector<2x10x10x16xf32> to vector<2x8x8x16xf32>
    %149 = vector.shape_cast %148 : vector<2x8x8x16xf32> to vector<128x16xf32>
    %150 = vector.extract_strided_slice %105 {offsets = [7, 0, 0], sizes = [1, 16, 128], strides = [1, 1, 1]} : vector<9x16x128xf32> to vector<1x16x128xf32>
    %151 = vector.shape_cast %150 : vector<1x16x128xf32> to vector<16x128xf32>
    %cst_55 = arith.constant dense<0.000000e+00> : vector<128x128xf32>
    %152 = tpu.matmul %149, %151, %cst_55 {dimension_numbers = #tpu.dot_dimension_numbers<[1], [0], [0], [1], [0, 0, 1, 1], [], []>} : vector<128x16xf32>, vector<16x128xf32>, vector<128x128xf32> -> vector<128x128xf32>
    %153 = arith.addf %147, %152 : vector<128x128xf32>
    %154 = vector.extract_strided_slice %71 {offsets = [0, 2, 2, 0], sizes = [2, 8, 8, 16], strides = [1, 1, 1, 1]} : vector<2x10x10x16xf32> to vector<2x8x8x16xf32>
    %155 = vector.shape_cast %154 : vector<2x8x8x16xf32> to vector<128x16xf32>
    %156 = vector.extract_strided_slice %105 {offsets = [8, 0, 0], sizes = [1, 16, 128], strides = [1, 1, 1]} : vector<9x16x128xf32> to vector<1x16x128xf32>
    %157 = vector.shape_cast %156 : vector<1x16x128xf32> to vector<16x128xf32>
    %cst_56 = arith.constant dense<0.000000e+00> : vector<128x128xf32>
    %158 = tpu.matmul %155, %157, %cst_56 {dimension_numbers = #tpu.dot_dimension_numbers<[1], [0], [0], [1], [0, 0, 1, 1], [], []>} : vector<128x16xf32>, vector<16x128xf32>, vector<128x128xf32> -> vector<128x128xf32>
    %159 = arith.addf %153, %158 : vector<128x128xf32>
    %c0_57 = arith.constant 0 : index
    %c0_58 = arith.constant 0 : index
    %160 = vector.load %arg6[%c0_57, %c0_58] : memref<1x128xf32, #tpu.memory_space<vmem>>, vector<1x128xf32>
    %161 = vector.broadcast %160 : vector<1x128xf32> to vector<128x128xf32>
    %162 = arith.addf %159, %161 : vector<128x128xf32>
    %cst_59 = arith.constant 0.000000e+00 : f32
    %163 = vector.broadcast %cst_59 : f32 to vector<128x128xf32>
    %164 = arith.cmpf oge, %162, %163 : vector<128x128xf32>
    %cst_60 = arith.constant 0.00999999977 : f32
    %165 = vector.broadcast %cst_60 : f32 to vector<128x128xf32>
    %166 = arith.mulf %165, %162 : vector<128x128xf32>
    %167 = arith.select %164, %162, %166 : vector<128x128xi1>, vector<128x128xf32>
    %168 = vector.shape_cast %167 : vector<128x128xf32> to vector<2x64x128xf32>
    %169 = vector.shape_cast %103 : vector<2x1xf32> to vector<2x1x1xf32>
    %170 = vector.broadcast %169 : vector<2x1x1xf32> to vector<2x64x128xf32>
    %171 = arith.mulf %168, %170 : vector<2x64x128xf32>
    %c0_61 = arith.constant 0 : index
    %c0_62 = arith.constant 0 : index
    %c0_63 = arith.constant 0 : index
    %172 = vector.load %arg11[%c0_61, %c0_62, %c0_63] : memref<2x64x128xf32, #tpu.memory_space<vmem>>, vector<2x64x128xf32>
    tpu.vector_store %arg11[%c0_61, %c0_62, %c0_63], %171 {strides = array<i32>} : memref<2x64x128xf32, #tpu.memory_space<vmem>>, vector<2x64x128xf32>,
    return
  }
  func.func @transform_0(%arg0: i32) -> (i32, i32, i32, i32) {
    %c0_i32 = arith.constant 0 : i32
    %c0_i32_0 = arith.constant 0 : i32
    %c0_i32_1 = arith.constant 0 : i32
    %c0_i32_2 = arith.constant 0 : i32
    %c0_i32_3 = arith.constant 0 : i32
    return %c0_i32, %c0_i32_0, %c0_i32_1, %c0_i32_2 : i32, i32, i32, i32
  }
  func.func @transform_1(%arg0: i32) -> (i32, i32, i32, i32) {
    %c0_i32 = arith.constant 0 : i32
    %c0_i32_0 = arith.constant 0 : i32
    %c0_i32_1 = arith.constant 0 : i32
    %c0_i32_2 = arith.constant 0 : i32
    %c0_i32_3 = arith.constant 0 : i32
    return %c0_i32, %c0_i32_0, %c0_i32_1, %c0_i32_2 : i32, i32, i32, i32
  }
  func.func @transform_2(%arg0: i32) -> (i32, i32, i32) {
    %c0_i32 = arith.constant 0 : i32
    %c0_i32_0 = arith.constant 0 : i32
    %c0_i32_1 = arith.constant 0 : i32
    %c0_i32_2 = arith.constant 0 : i32
    return %c0_i32, %c0_i32_0, %c0_i32_1 : i32, i32, i32
  }
  func.func @transform_3(%arg0: i32) -> (i32, i32) {
    %c0_i32 = arith.constant 0 : i32
    %c0_i32_0 = arith.constant 0 : i32
    %c0_i32_1 = arith.constant 0 : i32
    return %c0_i32, %c0_i32_0 : i32, i32
  }
  func.func @transform_4(%arg0: i32) -> (i32, i32, i32) {
    %c0_i32 = arith.constant 0 : i32
    %c0_i32_0 = arith.constant 0 : i32
    %c0_i32_1 = arith.constant 0 : i32
    %c0_i32_2 = arith.constant 0 : i32
    return %c0_i32, %c0_i32_0, %c0_i32_1 : i32, i32, i32
  }
  func.func @transform_5(%arg0: i32) -> (i32, i32) {
    %c0_i32 = arith.constant 0 : i32
    %c0_i32_0 = arith.constant 0 : i32
    %c0_i32_1 = arith.constant 0 : i32
    return %c0_i32, %c0_i32_0 : i32, i32
  }
  func.func @transform_6(%arg0: i32) -> (i32, i32) {
    %c0_i32 = arith.constant 0 : i32
    %c0_i32_0 = arith.constant 0 : i32
    %c0_i32_1 = arith.constant 0 : i32
    return %c0_i32, %c0_i32_0 : i32, i32
  }
  func.func @transform_7(%arg0: i32) -> (i32, i32) {
    %c0_i32 = arith.constant 0 : i32
    %c0_i32_0 = arith.constant 0 : i32
    %c0_i32_1 = arith.constant 0 : i32
    return %c0_i32, %c0_i32_0 : i32, i32
  }
  func.func @transform_8(%arg0: i32) -> (i32, i32) {
    %c0_i32 = arith.constant 0 : i32
    %c0_i32_0 = arith.constant 0 : i32
    %c0_i32_1 = arith.constant 0 : i32
    return %c0_i32, %c0_i32_0 : i32, i32
  }
  func.func @transform_9(%arg0: i32) -> (i32, i32) {
    %c0_i32 = arith.constant 0 : i32
    %c0_i32_0 = arith.constant 0 : i32
    %c0_i32_1 = arith.constant 0 : i32
    return %c0_i32, %c0_i32_0 : i32, i32
  }
  func.func @transform_10(%arg0: i32) -> (i32, i32, i32) {
    %c0_i32 = arith.constant 0 : i32
    %c0_i32_0 = arith.constant 0 : i32
    %c0_i32_1 = arith.constant 0 : i32
    %c0_i32_2 = arith.constant 0 : i32
    return %c0_i32, %c0_i32_0, %c0_i32_1 : i32, i32, i32
  }
}

</mosaic_0001>

<bundles_post_ra>
// kernel: scale_block_forward.1
= control target key start
LH: loop header
LB: loop body
LE: loop exit
PB: predicated region body
PF: predicated region fallthrough
CT: control target
= control target key end

     0   :  { %vm198_vm0 = vcmask 1043456   ;;  %vm116_vm1 = vcmask 1046528   ;;  %vm165_vm2 = vcmask 31744   ;;  %vm527_vm3 = vcmask 1045504   ;;  %s5753_s23 = smov 8   ;;  %s7656_s2 = inlined_call_operand.vmem [shape: f32[9,4,8], index: 2, kind: input, shape index: {}]   ;;  %s7657_s0 = inlined_call_operand.vmem [shape: f32[2,10,10,4], index: 0, kind: input, shape index: {}]   ;;  %s7658_s1 = inlined_call_operand.vmem [shape: f32[2,10,10,8], index: 1, kind: input, shape index: {}]   ;;  %s7659_s6 = inlined_call_operand.vmem [shape: f32[16,16], index: 6, kind: input, shape index: {}]   ;;  %s7660_s3 = inlined_call_operand.vmem [shape: f32[1,8], index: 3, kind: input, shape index: {}]   ;;  %s7661_s8 = inlined_call_operand.vmem [shape: f32[16,8], index: 8, kind: input, shape index: {}]   ;;  %s7662_s4 = inlined_call_operand.vmem [shape: f32[9,16,128], index: 4, kind: input, shape index: {}]   ;;  %s7663_s7 = inlined_call_operand.vmem [shape: f32[1,16], index: 7, kind: input, shape index: {}]   ;;  %s7664_s9 = inlined_call_operand.vmem [shape: f32[1,8], index: 9, kind: input, shape index: {}]   ;;  %s7665_s5 = inlined_call_operand.vmem [shape: f32[1,128], index: 5, kind: input, shape index: {}]   ;;  %s7666_s10 = inlined_call_operand.vmem [shape: f32[2,64,128], index: 10, kind: output, shape index: {}]  }
   0x1   :  { %v76_v0 = vld [vmem:[%s7656_s2 + $0x4] sm:$0xf]  ;;  %v5823_v2 = vld [vmem:[%s7657_s0 + $0x8] sm:$0x3]  ;;  %v75_v5 = vld [vmem:[%s7656_s2] sm:$0xf] }
   0x2   :  { %v5818_v1 = vld [vmem:[%s7657_s0] sm:$0xff]  ;;  %4947 = vmatprep.subr.msk.mxu0 %vm198_vm0, %v76_v0  ;;  %v118_v4 = vrot.slane %v5823_v2, 1  ;;  %v5834_v6 = vld [vmem:[%s7657_s0 + $0x10] sm:$0xff]  ;;  %v5840_v7 = vld [vmem:[%s7657_s0 + $0x18] sm:$0x3]  ;;  %vm5755_vm4 = vmmov 0  }
   0x3   :  { %v117_v3 = vrot.slane %v5818_v1, 1  ;;  %4948 = vmatpush3.msk.msra.mxu0 %vm198_vm0, %v76_v0  ;;  %v120_v8 = vrot.slane %v5834_v6, 1  ;;  %v5846_v9 = vld [vmem:[%s7657_s0 + $0x20] sm:$0xff]  ;;  %v5851_v10 = vld [vmem:[%s7657_s0 + $0x28] sm:$0x3]  ;;  %v121_v12 = vrot.slane %v5840_v7, 1 }
   0x4   :  { %4973 = vmatprep.subr.msk.mxu0 %vm198_vm0, %v75_v5  ;;  %v123_v13 = vrot.slane %v5846_v9, 1  ;;  %v5860_v14 = vld [vmem:[%s7657_s0 + $0x30] sm:$0xff]  ;;  %v5865_v15 = vld [vmem:[%s7657_s0 + $0x38] sm:$0x3]  ;;  %v124_v16 = vrot.slane %v5851_v10, 1  ;;  %v5874_v19 = vld [vmem:[%s7657_s0 + $0x40] sm:$0xff] }
   0x5   :  { %v119_v11 = vsel %vm116_vm1, %v117_v3, %v118_v4  ;;  %v126_v17 = vrot.slane %v5860_v14, 1  ;;  %v127_v18 = vrot.slane %v5865_v15, 1  ;;  %v5879_v20 = vld [vmem:[%s7657_s0 + $0x48] sm:$0x3]  ;;  %v5882_v21 = vsel %vm116_vm1, %v120_v8, %v121_v12  ;;  %v5889_v24 = vld [vmem:[%s7657_s0 + $0x50] sm:$0xff]  ;;  %v5899_v26 = vld [vmem:[%s7657_s0 + $0x60] sm:$0xff] }
   0x6   :  { %4949 = vmatprep.mubr.msk.f32.mxu0 %vm165_vm2, %v119_v11  ;;  %v129_v22 = vrot.slane %v5874_v19, 1  ;;  %v130_v23 = vrot.slane %v5879_v20, 1  ;;  %v5894_v25 = vld [vmem:[%s7657_s0 + $0x58] sm:$0x3]  ;;  %v5904_v27 = vsel %vm116_vm1, %v123_v13, %v124_v16  ;;  %v5909_v28 = vld [vmem:[%s7657_s0 + $0x68] sm:$0x3] }
   0x7   :  { %4950 = vmatmul.mubr.msk.f32.vlgmr.msra.gmra.mrb[0].mxu0 %vm165_vm2, %v5882_v21  ;;  %v5915_v29 = vsel %vm116_vm1, %v126_v17, %v127_v18  ;;  %v132_v30 = vrot.slane %v5889_v24, 1  ;;  %v133_v31 = vrot.slane %v5894_v25, 1  ;;  %v135_v33 = vrot.slane %v5899_v26, 1  ;;  %v5927_v35 = vld [vmem:[%s7657_s0 + $0x70] sm:$0xff]  ;;  %v5932_v36 = vld [vmem:[%s7657_s0 + $0x78] sm:$0x3] }
   0x8   :  { %4974 = vmatpush3.msk.msra.mxu0 %vm198_vm0, %v75_v5  ;;  %4952 = vmatprep.mubr.msk.f32.mxu0 %vm165_vm2, %v5904_v27  ;;  %v5920_v32 = vsel %vm116_vm1, %v129_v22, %v130_v23  ;;  %v136_v34 = vrot.slane %v5909_v28, 1  ;;  %v5937_v37 = vld [vmem:[%s7657_s0 + $0xa0] sm:$0xff]  ;;  %v56_v38 = vld [vmem:[%s7657_s0 + $0xa8] sm:$0x3]  ;;  %v138_v40 = vrot.slane %v5927_v35, 1  ;;  %v139_v41 = vrot.slane %v5932_v36, 1 }
   0x9   :  { %v5947_v39 = vsel %vm116_vm1, %v132_v30, %v133_v31  ;;  %v141_v43 = vrot.slane %v5937_v37, 1  ;;  %v142_v44 = vrot.slane %v56_v38, 1  ;;  %v5958_v45 = vld [vmem:[%s7657_s0 + $0xb0] sm:$0xff]  ;;  %v5963_v46 = vld [vmem:[%s7657_s0 + $0xb8] sm:$0x3]  ;;  %v5968_v47 = vld [vmem:[%s7657_s0 + $0xc0] sm:$0xff] }
   0xa   :  { %v5952_v42 = vsel %vm116_vm1, %v135_v33, %v136_v34  ;;  %v5973_v48 = vld [vmem:[%s7657_s0 + $0xc8] sm:$0x3]  ;;  %v5983_v50 = vsel %vm116_vm1, %v138_v40, %v139_v41  ;;  %v144_v51 = vrot.slane %v5958_v45, 1  ;;  %v145_v52 = vrot.slane %v5963_v46, 1  ;;  %v5994_v56 = vld [vmem:[%s7657_s0 + $0xd0] sm:$0xff]  ;;  %v6004_v58 = vld [vmem:[%s7657_s0 + $0xe0] sm:$0xff] }
   0xb   :  { %4953 = vmatmul.mubr.msk.f32.gmra.mrb[2].mxu0 %vm165_vm2, %v5915_v29  ;;  %v77_v49 = vld [vmem:[%s7656_s2 + $0x8] sm:$0xf]  ;;  %v143_v53 = vsel %vm116_vm1, %v141_v43, %v142_v44  ;;  %v147_v54 = vrot.slane %v5968_v47, 1  ;;  %v148_v55 = vrot.slane %v5973_v48, 1  ;;  %v5999_v57 = vld [vmem:[%s7657_s0 + $0xd8] sm:$0x3] }
   0xc   :  { %4955 = vmatprep.mubr.msk.f32.mxu0 %vm165_vm2, %v5920_v32  ;;  %4999 = vmatprep.subr.msk.mxu0 %vm198_vm0, %v77_v49  ;;  %v6009_v59 = vld [vmem:[%s7657_s0 + $0xe8] sm:$0x3]  ;;  %v6015_v60 = vsel %vm116_vm1, %v144_v51, %v145_v52  ;;  %v150_v61 = vrot.slane %v5994_v56, 1  ;;  %v151_v62 = vrot.slane %v5999_v57, 1  ;;  %v153_v0 = vrot.slane %v6004_v58, 1  ;;  %v6027_v4 = vld [vmem:[%s7657_s0 + $0xf0] sm:$0xff] }
   0xd   :  { %v6020_v63 = vsel %vm116_vm1, %v147_v54, %v148_v55  ;;  %v154_v3 = vrot.slane %v6009_v59, 1  ;;  %v6032_v5 = vld [vmem:[%s7657_s0 + $0xf8] sm:$0x3]  ;;  %v552_v8 = vrot.slane %v5937_v37, 2  ;;  %v6038_v11 = vld [vmem:[%s7657_s0 + $0x100] sm:$0xff]  ;;  %v553_v13 = vrot.slane %v56_v38, 2 }
   0xe   :  { %v6043_v12 = vld [vmem:[%s7657_s0 + $0x108] sm:$0x3]  ;;  %v6050_v16 = vsel %vm116_vm1, %v150_v61, %v151_v62  ;;  %v156_v17 = vrot.slane %v6027_v4, 1  ;;  %v157_v18 = vrot.slane %v6032_v5, 1  ;;  %v159_v30 = vrot.slane %v6038_v11, 1  ;;  %v6065_v33 = vld [vmem:[%s7657_s0 + $0x110] sm:$0xff] }
   0xf   :  { %4956 = vmatmul.mubr.msk.f32.gmra.mrb[4].mxu0 %vm165_vm2, %v5947_v39  ;;  %v6055_v22 = vsel %vm527_vm3, %v552_v8, %v553_v13  ;;  %v6058_v23 = vsel %vm116_vm1, %v153_v0, %v154_v3  ;;  %v160_v31 = vrot.slane %v6043_v12, 1  ;;  %v6070_v34 = vld [vmem:[%s7657_s0 + $0x118] sm:$0x3]  ;;  %v162_v40 = vrot.slane %v6065_v33, 1  ;;  %v78_v51 = vld [vmem:[%s7656_s2 + $0xc] sm:$0xf] }
  0x10   :  { %4958 = vmatprep.mubr.msk.f32.mxu0 %vm165_vm2, %v5952_v42  ;;  %v6077_v38 = vsel %vm116_vm1, %v156_v17, %v157_v18  ;;  %v163_v41 = vrot.slane %v6070_v34, 1  ;;  %v528_v52 = vrot.slane %v5818_v1, 2  ;;  %v534_v55 = vrot.slane %v5846_v9, 2 }
  0x11   :  { %v6082_v43 = vsel %vm116_vm1, %v159_v30, %v160_v31  ;;  %v535_v61 = vrot.slane %v5851_v10, 2  ;;  %v540_v0 = vrot.slane %v5874_v19, 2  ;;  %v541_v3 = vrot.slane %v5879_v20, 2  ;;  %v79_v10 = vld [vmem:[%s7656_s2 + $0x10] sm:$0xf] }
  0x12   :  { %v6089_v44 = vsel %vm116_vm1, %v162_v40, %v163_v41  ;;  %v543_v8 = vrot.slane %v5889_v24, 2  ;;  %v544_v13 = vrot.slane %v5894_v25, 2  ;;  %v546_v17 = vrot.slane %v5899_v26, 2 }
  0x13   :  { %4959 = vmatmul.mubr.msk.f32.gmra.mrb[6].mxu0 %vm165_vm2, %v5983_v50  ;;  %v6144_v62 = vsel %vm527_vm3, %v534_v55, %v535_v61  ;;  %v6162_v20 = vsel %vm527_vm3, %v540_v0, %v541_v3  ;;  %v547_v18 = vrot.slane %v5909_v28, 2  ;;  %v549_v25 = vrot.slane %v5927_v35, 2 }
  0x14   :  { %4961 = vmatprep.mubr.msk.f32.mxu0 %vm165_vm2, %v143_v53  ;;  %v531_v53 = vrot.slane %v5834_v6, 2  ;;  %v6172_v30 = vsel %vm527_vm3, %v543_v8, %v544_v13  ;;  %v550_v31 = vrot.slane %v5932_v36, 2  ;;  %v555_v41 = vrot.slane %v5958_v45, 2  ;;  %v52_v8 = vld [vmem:[%s7657_s0 + $0x88] sm:$0x3] }
  0x15   :  { %v6177_v40 = vsel %vm527_vm3, %v546_v17, %v547_v18  ;;  %v559_v36 = vrot.slane %v5973_v48, 2  ;;  %v565_v48 = vrot.slane %v6009_v59, 2  ;;  %v567_v55 = vrot.slane %v6027_v4, 2  ;;  %v6323_v18 = vld [vmem:[%s7657_s0 + $0x128] sm:$0x3] }
  0x16   :  { %v6184_v28 = vsel %vm527_vm3, %v549_v25, %v550_v31  ;;  %v571_v59 = vrot.slane %v6043_v12, 2  ;;  %v573_v0 = vrot.slane %v6065_v33, 2  ;;  %v945_v13 = vrot.slane %v52_v8, 1 }
  0x17   :  { %4962 = vmatmul.mubr.msk.f32.gmra.mrb[8].mxu0 %vm165_vm2, %v6015_v60  ;;  %vm2164_vm5 = vcmask 64512   ;;  %vm2205_vm6 = vcmask 130048   ;;  %vm2225_vm7 = vcmask 123904   ;;  %vm1931_vm10 = vcmask 1040384  }
  0x18   :  { %4964 = vmatprep.mubr.msk.f32.mxu0 %vm165_vm2, %v6020_v63 }
  0x1b   :  { %4965 = vmatmul.mubr.msk.f32.gmra.mrb[10].mxu0 %vm165_vm2, %v6050_v16 }
  0x1c   :  { %4967 = vmatprep.mubr.msk.f32.mxu0 %vm165_vm2, %v6058_v23 }
  0x1f   :  { %4968 = vmatmul.mubr.msk.f32.gmra.mrb[12].mxu0 %vm165_vm2, %v6077_v38 }
  0x20   :  { %4970 = vmatprep.mubr.msk.f32.mxu0 %vm165_vm2, %v6082_v43 }
  0x23   :  { %4971 = vmatmul.mubr.msk.f32.gmra.mrb[14].mxu0 %vm165_vm2, %v6089_v44 }
  0x24   :  { %4975 = vmatprep.mubr.msk.f32.mxu0 %vm165_vm2, %v5818_v1 }
  0x27   :  { %4976 = vmatmul.mubr.msk.f32.vlgmr.msra.gmra.mrb[0].mxu0 %vm165_vm2, %v5834_v6 }
  0x28   :  { %5000 = vmatpush3.msk.msra.mxu0 %vm198_vm0, %v77_v49  ;;  %4978 = vmatprep.mubr.msk.f32.mxu0 %vm165_vm2, %v5846_v9  ;;  %v529_v49 = vrot.slane %v5823_v2, 2  ;;  %v537_v2 = vrot.slane %v5860_v14, 2 }
  0x29   :  { %5025 = vmatprep.subr.msk.mxu0 %vm198_vm0, %v78_v51 }
  0x2a   :  { %v530_v54 = vsel %vm527_vm3, %v528_v52, %v529_v49  ;;  %v558_v49 = vrot.slane %v5968_v47, 2 }
  0x2b   :  { %4979 = vmatmul.mubr.msk.f32.gmra.mrb[2].mxu0 %vm165_vm2, %v5860_v14 }
  0x2c   :  { %4981 = vmatprep.mubr.msk.f32.mxu0 %vm165_vm2, %v5874_v19 }
  0x2f   :  { %4982 = vmatmul.mubr.msk.f32.gmra.mrb[4].mxu0 %vm165_vm2, %v5889_v24 }
  0x30   :  { %4984 = vmatprep.mubr.msk.f32.mxu0 %vm165_vm2, %v5899_v26 }
  0x33   :  { %4985 = vmatmul.mubr.msk.f32.gmra.mrb[6].mxu0 %vm165_vm2, %v5927_v35 }
  0x34   :  { %4987 = vmatprep.mubr.msk.f32.mxu0 %vm165_vm2, %v5937_v37  ;;  %v532_v37 = vrot.slane %v5840_v7, 2  ;;  %v538_v7 = vrot.slane %v5865_v15, 2 }
  0x36   :  { %v6139_v1 = vsel %vm527_vm3, %v531_v53, %v532_v37  ;;  %v6157_v15 = vsel %vm527_vm3, %v537_v2, %v538_v7  ;;  %v561_v37 = vrot.slane %v5994_v56, 2  ;;  %v562_v53 = vrot.slane %v5999_v57, 2 }
  0x37   :  { %4988 = vmatmul.mubr.msk.f32.gmra.mrb[8].mxu0 %vm165_vm2, %v5958_v45  ;;  %v568_v57 = vrot.slane %v6032_v5, 2  ;;  %v570_v2 = vrot.slane %v6038_v11, 2  ;;  %v574_v5 = vrot.slane %v6070_v34, 2  ;;  %v80_v34 = vld [vmem:[%s7656_s2 + $0x14] sm:$0xf] }
  0x38   :  { %4990 = vmatprep.mubr.msk.f32.mxu0 %vm165_vm2, %v5968_v47 }
  0x39   :  { %v6223_v7 = vsel %vm527_vm3, %v567_v55, %v568_v57  ;;  %v6228_v3 = vsel %vm527_vm3, %v570_v2, %v571_v59  ;;  %v6235_v12 = vsel %vm527_vm3, %v573_v0, %v574_v5  ;;  %v1987_v55 = vld [vmem:[%s7658_s1 + $0xb8] sm:$0x3]  ;;  %v1986_v57 = vld [vmem:[%s7658_s1 + $0xb0] sm:$0xff]  ;;  %v1969_v59 = vld [vmem:[%s7658_s1 + $0x28] sm:$0x3] }
  0x3a   :  { %v1968_v0 = vld [vmem:[%s7658_s1 + $0x20] sm:$0xff]  ;;  %v1989_v5 = vld [vmem:[%s7658_s1 + $0xc8] sm:$0x3] }
  0x3b   :  { %4991 = vmatmul.mubr.msk.f32.gmra.mrb[10].mxu0 %vm165_vm2, %v5994_v56 }
  0x3c   :  { %4993 = vmatprep.mubr.msk.f32.mxu0 %vm165_vm2, %v6004_v58 }
  0x3f   :  { %4994 = vmatmul.mubr.msk.f32.gmra.mrb[12].mxu0 %vm165_vm2, %v6027_v4 }
  0x40   :  { %4996 = vmatprep.mubr.msk.f32.mxu0 %vm165_vm2, %v6038_v11 }
  0x43   :  { %4997 = vmatmul.mubr.msk.f32.gmra.mrb[14].mxu0 %vm165_vm2, %v6065_v33 }
  0x44   :  { %5001 = vmatprep.mubr.msk.f32.mxu0 %vm165_vm2, %v530_v54  ;;  %v6200_v54 = vsel %vm527_vm3, %v558_v49, %v559_v36  ;;  %v82_v49 = vld [vmem:[%s7656_s2 + $0x1c] sm:$0xf]  ;;  %v1965_v36 = vld [vmem:[%s7658_s1 + $0x8] sm:$0x3] }
  0x47   :  { %5002 = vmatmul.mubr.msk.f32.vlgmr.msra.gmra.mrb[0].mxu0 %vm165_vm2, %v6139_v1 }
  0x48   :  { %5026 = vmatpush3.msk.msra.mxu0 %vm198_vm0, %v78_v51  ;;  %5004 = vmatprep.mubr.msk.f32.mxu0 %vm165_vm2, %v6144_v62  ;;  %v556_v51 = vrot.slane %v5963_v46, 2  ;;  %v564_v46 = vrot.slane %v6004_v58, 2 }
  0x49   :  { %5051 = vmatprep.subr.msk.mxu0 %vm198_vm0, %v79_v10 }
  0x4a   :  { %v6195_v52 = vsel %vm527_vm3, %v555_v41, %v556_v51  ;;  %v6214_v61 = vsel %vm527_vm3, %v564_v46, %v565_v48  ;;  %v1966_v41 = vld [vmem:[%s7658_s1 + $0x10] sm:$0xff]  ;;  %v1964_v51 = vld [vmem:[%s7658_s1] sm:$0xff]  ;;  %v1119_v48 = vrot.slane %v52_v8, 2 }
  0x4b   :  { %5005 = vmatmul.mubr.msk.f32.gmra.mrb[2].mxu0 %vm165_vm2, %v6157_v15  ;;  %2048 = vrot.lane.b32.xlu1 %v1966_v41, %s5753_s23  ;;  %v1972_v41 = vld [vmem:[%s7658_s1 + $0x40] sm:$0xff] }
  0x4c   :  { %5007 = vmatprep.mubr.msk.f32.mxu0 %vm165_vm2, %v6162_v20  ;;  %2044 = vrot.lane.b32.xlu0 %v1964_v51, %s5753_s23  ;;  %v83_v51 = vld [vmem:[%s7656_s2 + $0x20] sm:$0xf] }
  0x4f   :  { %5008 = vmatmul.mubr.msk.f32.gmra.mrb[4].mxu0 %vm165_vm2, %v6172_v30 }
  0x50   :  { %5010 = vmatprep.mubr.msk.f32.mxu0 %vm165_vm2, %v6177_v40  ;;  %2046 = vrot.lane.b32.xlu0 %v1965_v36, %s5753_s23  ;;  %v1992_v36 = vld [vmem:[%s7658_s1 + $0xe0] sm:$0xff] }
  0x53   :  { %5011 = vmatmul.mubr.msk.f32.gmra.mrb[6].mxu0 %vm165_vm2, %v6184_v28 }
  0x54   :  { %5013 = vmatprep.mubr.msk.f32.mxu0 %vm165_vm2, %v6055_v22  ;;  %v6209_v22 = vsel %vm527_vm3, %v561_v37, %v562_v53  ;;  %v1985_v37 = vld [vmem:[%s7658_s1 + $0xa8] sm:$0x3]  ;;  %v1984_v53 = vld [vmem:[%s7658_s1 + $0xa0] sm:$0xff] }
  0x55   :  { %2084 = vrot.lane.b32.xlu0 %v1984_v53, %s5753_s23  ;;  %v2001_v53 = vld [vmem:[%s7658_s1 + $0x128] sm:$0x3] }
  0x57   :  { %5014 = vmatmul.mubr.msk.f32.gmra.mrb[8].mxu0 %vm165_vm2, %v6195_v52 }
  0x58   :  { %5016 = vmatprep.mubr.msk.f32.mxu0 %vm165_vm2, %v6200_v54 }
  0x59   :  { %2088 = vrot.lane.b32.xlu0 %v1986_v57, %s5753_s23  ;;  %v2003_v57 = vld [vmem:[%s7658_s1 + $0x138] sm:$0x3] }
  0x5b   :  { %5017 = vmatmul.mubr.msk.f32.gmra.mrb[10].mxu0 %vm165_vm2, %v6209_v22 }
  0x5c   :  { %5019 = vmatprep.mubr.msk.f32.mxu0 %vm165_vm2, %v6214_v61 }
  0x5d   :  { %2052 = vrot.lane.b32.xlu0 %v1968_v0, %s5753_s23 }
  0x5f   :  { %5020 = vmatmul.mubr.msk.f32.gmra.mrb[12].mxu0 %vm165_vm2, %v6223_v7 }
  0x60   :  { %5022 = vmatprep.mubr.msk.f32.mxu0 %vm165_vm2, %v6228_v3 }
  0x63   :  { %5023 = vmatmul.mubr.msk.f32.gmra.mrb[14].mxu0 %vm165_vm2, %v6235_v12 }
  0x64   :  { %5027 = vmatprep.mubr.msk.f32.mxu0 %vm165_vm2, %v5834_v6  ;;  %v6261_v6 = vld [vmem:[%s7657_s0 + $0x80] sm:$0xff] }
  0x65   :  { %v1118_v46 = vrot.slane %v6261_v6, 2 }
  0x67   :  { %5028 = vmatmul.mubr.msk.f32.vlgmr.msra.gmra.mrb[0].mxu0 %vm165_vm2, %v5846_v9  ;;  %v6391_v2 = vsel %vm527_vm3, %v1118_v46, %v1119_v48  ;;  %v2000_v46 = vld [vmem:[%s7658_s1 + $0x120] sm:$0xff]  ;;  %v1982_v48 = vld [vmem:[%s7658_s1 + $0x90] sm:$0xff] }
  0x68   :  { %5052 = vmatpush3.msk.msra.mxu0 %vm198_vm0, %v79_v10  ;;  %5030 = vmatprep.mubr.msk.f32.mxu0 %vm165_vm2, %v5860_v14  ;;  %v81_v10 = vld [vmem:[%s7656_s2 + $0x18] sm:$0xf] }
  0x69   :  { %5077 = vmatprep.subr.msk.mxu0 %vm198_vm0, %v80_v34 }
  0x6b   :  { %5031 = vmatmul.mubr.msk.f32.gmra.mrb[2].mxu0 %vm165_vm2, %v5874_v19 }
  0x6c   :  { %5033 = vmatprep.mubr.msk.f32.mxu0 %vm165_vm2, %v5889_v24 }
  0x6f   :  { %5034 = vmatmul.mubr.msk.f32.gmra.mrb[4].mxu0 %vm165_vm2, %v5899_v26 }
  0x70   :  { %5036 = vmatprep.mubr.msk.f32.mxu0 %vm165_vm2, %v5927_v35 }
  0x73   :  { %5037 = vmatmul.mubr.msk.f32.gmra.mrb[6].mxu0 %vm165_vm2, %v6261_v6 }
  0x74   :  { %5039 = vmatprep.mubr.msk.f32.mxu0 %vm165_vm2, %v5958_v45  ;;  %v6282_v45 = vld [vmem:[%s7657_s0 + $0x120] sm:$0xff] }
  0x75   :  { %v947_v25 = vrot.slane %v6282_v45, 1  ;;  %v1121_v8 = vrot.slane %v6282_v45, 2 }
  0x77   :  { %5040 = vmatmul.mubr.msk.f32.gmra.mrb[8].mxu0 %vm165_vm2, %v5968_v47 }
  0x78   :  { %5042 = vmatprep.mubr.msk.f32.mxu0 %vm165_vm2, %v5994_v56 }
  0x7b   :  { %5043 = vmatmul.mubr.msk.f32.gmra.mrb[10].mxu0 %vm165_vm2, %v6004_v58 }
  0x7c   :  { %5045 = vmatprep.mubr.msk.f32.mxu0 %vm165_vm2, %v6027_v4 }
  0x7f   :  { %5046 = vmatmul.mubr.msk.f32.gmra.mrb[12].mxu0 %vm165_vm2, %v6038_v11 }
  0x80   :  { %5048 = vmatprep.mubr.msk.f32.mxu0 %vm165_vm2, %v6065_v33 }
  0x83   :  { %5049 = vmatmul.mubr.msk.f32.gmra.mrb[14].mxu0 %vm165_vm2, %v6282_v45 }
  0x84   :  { %5053 = vmatprep.mubr.msk.f32.mxu0 %vm165_vm2, %v5882_v21  ;;  %v944_v21 = vrot.slane %v6261_v6, 1 }
  0x86   :  { %v6310_v17 = vsel %vm116_vm1, %v944_v21, %v945_v13  ;;  %v1122_v21 = vrot.slane %v6323_v18, 2  ;;  %v1991_v13 = vld [vmem:[%s7658_s1 + $0xd8] sm:$0x3] }
  0x87   :  { %5054 = vmatmul.mubr.msk.f32.vlgmr.msra.gmra.mrb[0].mxu0 %vm165_vm2, %v5904_v27 }
  0x88   :  { %5078 = vmatpush3.msk.msra.mxu0 %vm198_vm0, %v80_v34  ;;  %5056 = vmatprep.mubr.msk.f32.mxu0 %vm165_vm2, %v5915_v29  ;;  %v1988_v34 = vld [vmem:[%s7658_s1 + $0xc0] sm:$0xff] }
  0x89   :  { %5103 = vmatprep.subr.msk.mxu0 %vm198_vm0, %v81_v10  ;;  %2092 = vrot.lane.b32.xlu0 %v1988_v34, %s5753_s23  ;;  %v2303_v34 = vld [vmem:[%s7659_s6] sm:$0xff] }
  0x8b   :  { %5057 = vmatmul.mubr.msk.f32.gmra.mrb[2].mxu0 %vm165_vm2, %v5920_v32 }
  0x8c   :  { %5059 = vmatprep.mubr.msk.f32.mxu0 %vm165_vm2, %v5947_v39 }
  0x8f   :  { %5060 = vmatmul.mubr.msk.f32.gmra.mrb[4].mxu0 %vm165_vm2, %v5952_v42 }
  0x90   :  { %5062 = vmatprep.mubr.msk.f32.mxu0 %vm165_vm2, %v5983_v50 }
  0x93   :  { %5063 = vmatmul.mubr.msk.f32.gmra.mrb[6].mxu0 %vm165_vm2, %v6310_v17 }
  0x94   :  { %5065 = vmatprep.mubr.msk.f32.mxu0 %vm165_vm2, %v6015_v60  ;;  %v948_v60 = vrot.slane %v6323_v18, 1  ;;  %v6444_v18 = vsel %vm527_vm3, %v1121_v8, %v1122_v21 }
  0x96   :  { %v6336_v31 = vsel %vm116_vm1, %v947_v25, %v948_v60  ;;  %v1990_v25 = vld [vmem:[%s7658_s1 + $0xd0] sm:$0xff]  ;;  %v1973_v60 = vld [vmem:[%s7658_s1 + $0x48] sm:$0x3] }
  0x97   :  { %5066 = vmatmul.mubr.msk.f32.gmra.mrb[8].mxu0 %vm165_vm2, %v6020_v63 }
  0x98   :  { %5068 = vmatprep.mubr.msk.f32.mxu0 %vm165_vm2, %v6050_v16 }
  0x9b   :  { %5069 = vmatmul.mubr.msk.f32.gmra.mrb[10].mxu0 %vm165_vm2, %v6058_v23 }
  0x9c   :  { %5071 = vmatprep.mubr.msk.f32.mxu0 %vm165_vm2, %v6077_v38 }
  0x9f   :  { %5072 = vmatmul.mubr.msk.f32.gmra.mrb[12].mxu0 %vm165_vm2, %v6082_v43 }
  0xa0   :  { %5074 = vmatprep.mubr.msk.f32.mxu0 %vm165_vm2, %v6089_v44 }
  0xa3   :  { %5075 = vmatmul.mubr.msk.f32.gmra.mrb[14].mxu0 %vm165_vm2, %v6336_v31 }
  0xa4   :  { %5079 = vmatprep.mubr.msk.f32.mxu0 %vm165_vm2, %v6139_v1  ;;  %v1967_v1 = vld [vmem:[%s7658_s1 + $0x18] sm:$0x3] }
  0xa5   :  { %2050 = vrot.lane.b32.xlu1 %v1967_v1, %s5753_s23  ;;  %v1993_v1 = vld [vmem:[%s7658_s1 + $0xe8] sm:$0x3] }
  0xa7   :  { %5080 = vmatmul.mubr.msk.f32.vlgmr.msra.gmra.mrb[0].mxu0 %vm165_vm2, %v6144_v62 }
  0xa8   :  { %5104 = vmatpush3.msk.msra.mxu0 %vm198_vm0, %v81_v10  ;;  %5082 = vmatprep.mubr.msk.f32.mxu0 %vm165_vm2, %v6157_v15  ;;  %v1970_v10 = vld [vmem:[%s7658_s1 + $0x30] sm:$0xff] }
  0xa9   :  { %5129 = vmatprep.subr.msk.mxu0 %vm198_vm0, %v82_v49  ;;  %2086 = vrot.lane.b32.xlu1 %v1985_v37, %s5753_s23  ;;  %v1996_v37 = vld [vmem:[%s7658_s1 + $0x100] sm:$0xff] }
  0xaa   :  { %2056 = vrot.lane.b32.xlu0 %v1970_v10, %s5753_s23 }
  0xab   :  { %5083 = vmatmul.mubr.msk.f32.gmra.mrb[2].mxu0 %vm165_vm2, %v6162_v20 }
  0xac   :  { %5085 = vmatprep.mubr.msk.f32.mxu0 %vm165_vm2, %v6172_v30 }
  0xad   :  { %2090 = vrot.lane.b32.xlu1 %v1987_v55, %s5753_s23 }
  0xae   :  { %2096 = vrot.lane.b32.xlu0 %v1990_v25, %s5753_s23 }
  0xaf   :  { %5086 = vmatmul.mubr.msk.f32.gmra.mrb[4].mxu0 %vm165_vm2, %v6177_v40 }
  0xb0   :  { %5088 = vmatprep.mubr.msk.f32.mxu0 %vm165_vm2, %v6184_v28 }
  0xb1   :  { %2054 = vrot.lane.b32.xlu1 %v1969_v59, %s5753_s23 }
  0xb2   :  { %2060 = vrot.lane.b32.xlu0 %v1972_v41, %s5753_s23 }
  0xb3   :  { %5089 = vmatmul.mubr.msk.f32.gmra.mrb[6].mxu0 %vm165_vm2, %v6391_v2 }
  0xb4   :  { %5091 = vmatprep.mubr.msk.f32.mxu0 %vm165_vm2, %v6195_v52  ;;  %v1971_v52 = vld [vmem:[%s7658_s1 + $0x38] sm:$0x3] }
  0xb5   :  { %2094 = vrot.lane.b32.xlu1 %v1989_v5, %s5753_s23  ;;  %v5754_v5 = vmov 0.0|0.0  }
  0xb6   :  { %2100 = vrot.lane.b32.xlu0 %v1992_v36, %s5753_s23  ;;  %5450 = vmatprep.subr.bf16.mxu1 %v5754_v5 }
  0xb7   :  { %5092 = vmatmul.mubr.msk.f32.gmra.mrb[8].mxu0 %vm165_vm2, %v6200_v54 }
  0xb8   :  { %5094 = vmatprep.mubr.msk.f32.mxu0 %vm165_vm2, %v6209_v22 }
  0xb9   :  { %2058 = vrot.lane.b32.xlu1 %v1971_v52, %s5753_s23  ;;  %v2304_v52 = vld [vmem:[%s7659_s6 + $0x8] sm:$0xff] }
  0xba   :  { %v5448_v8 = vpack.c.bf16 %v2304_v52, %v2303_v34 }
  0xbb   :  { %5095 = vmatmul.mubr.msk.f32.gmra.mrb[10].mxu0 %vm165_vm2, %v6214_v61 }
  0xbc   :  { %5097 = vmatprep.mubr.msk.f32.mxu0 %vm165_vm2, %v6223_v7 }
  0xbd   :  { %2098 = vrot.lane.b32.xlu1 %v1991_v13, %s5753_s23 }
  0xbf   :  { %5098 = vmatmul.mubr.msk.f32.gmra.mrb[12].mxu0 %vm165_vm2, %v6228_v3 }
  0xc0   :  { %5100 = vmatprep.mubr.msk.f32.mxu0 %vm165_vm2, %v6235_v12 }
  0xc1   :  { %2062 = vrot.lane.b32.xlu1 %v1973_v60, %s5753_s23 }
  0xc3   :  { %5101 = vmatmul.mubr.msk.f32.gmra.mrb[14].mxu0 %vm165_vm2, %v6444_v18 }
  0xc4   :  { %5105 = vmatprep.mubr.msk.f32.mxu0 %vm165_vm2, %v5846_v9  ;;  %v1975_v9 = vld [vmem:[%s7658_s1 + $0x58] sm:$0x3] }
  0xc5   :  { %2102 = vrot.lane.b32.xlu1 %v1993_v1, %s5753_s23 }
  0xc7   :  { %5106 = vmatmul.mubr.msk.f32.vlgmr.msra.gmra.mrb[0].mxu0 %vm165_vm2, %v5860_v14  ;;  %v1974_v14 = vld [vmem:[%s7658_s1 + $0x50] sm:$0xff] }
  0xc8   :  { %5130 = vmatpush3.msk.msra.mxu0 %vm198_vm0, %v82_v49  ;;  %5108 = vmatprep.mubr.msk.f32.mxu0 %vm165_vm2, %v5874_v19  ;;  %v1995_v19 = vld [vmem:[%s7658_s1 + $0xf8] sm:$0x3]  ;;  %v1997_v49 = vld [vmem:[%s7658_s1 + $0x108] sm:$0x3] }
  0xc9   :  { %5155 = vmatprep.subr.msk.mxu0 %vm198_vm0, %v83_v51  ;;  %2066 = vrot.lane.b32.xlu1 %v1975_v9, %s5753_s23 }
  0xca   :  { %2064 = vrot.lane.b32.xlu0 %v1974_v14, %s5753_s23 }
  0xcb   :  { %5109 = vmatmul.mubr.msk.f32.gmra.mrb[2].mxu0 %vm165_vm2, %v5889_v24  ;;  %v1994_v24 = vld [vmem:[%s7658_s1 + $0xf0] sm:$0xff] }
  0xcc   :  { %5111 = vmatprep.mubr.msk.f32.mxu0 %vm165_vm2, %v5899_v26  ;;  %v6502_v26 = vld [vmem:[%s7657_s0 + $0x90] sm:$0xff] }
  0xcd   :  { %2106 = vrot.lane.b32.xlu1 %v1995_v19, %s5753_s23 }
  0xce   :  { %2104 = vrot.lane.b32.xlu0 %v1994_v24, %s5753_s23 }
  0xcf   :  { %5112 = vmatmul.mubr.msk.f32.gmra.mrb[4].mxu0 %vm165_vm2, %v5927_v35  ;;  %v1977_v35 = vld [vmem:[%s7658_s1 + $0x68] sm:$0x3] }
  0xd0   :  { %5114 = vmatprep.mubr.msk.f32.mxu0 %vm165_vm2, %v6261_v6  ;;  %v1976_v6 = vld [vmem:[%s7658_s1 + $0x60] sm:$0xff] }
  0xd1   :  { %2070 = vrot.lane.b32.xlu1 %v1977_v35, %s5753_s23 }
  0xd2   :  { %2068 = vrot.lane.b32.xlu0 %v1976_v6, %s5753_s23 }
  0xd3   :  { %5115 = vmatmul.mubr.msk.f32.gmra.mrb[6].mxu0 %vm165_vm2, %v6502_v26 }
  0xd4   :  { %5117 = vmatprep.mubr.msk.f32.mxu0 %vm165_vm2, %v5968_v47  ;;  %v1979_v47 = vld [vmem:[%s7658_s1 + $0x78] sm:$0x3] }
  0xd5   :  { %2110 = vrot.lane.b32.xlu1 %v1997_v49, %s5753_s23 }
  0xd6   :  { %2108 = vrot.lane.b32.xlu0 %v1996_v37, %s5753_s23 }
  0xd7   :  { %5118 = vmatmul.mubr.msk.f32.gmra.mrb[8].mxu0 %vm165_vm2, %v5994_v56  ;;  %v1978_v56 = vld [vmem:[%s7658_s1 + $0x70] sm:$0xff] }
  0xd8   :  { %5120 = vmatprep.mubr.msk.f32.mxu0 %vm165_vm2, %v6004_v58  ;;  %v1999_v58 = vld [vmem:[%s7658_s1 + $0x118] sm:$0x3] }
  0xd9   :  { %2074 = vrot.lane.b32.xlu1 %v1979_v47, %s5753_s23 }
  0xda   :  { %2072 = vrot.lane.b32.xlu0 %v1978_v56, %s5753_s23 }
  0xdb   :  { %5121 = vmatmul.mubr.msk.f32.gmra.mrb[10].mxu0 %vm165_vm2, %v6027_v4  ;;  %v1998_v4 = vld [vmem:[%s7658_s1 + $0x110] sm:$0xff] }
  0xdc   :  { %5123 = vmatprep.mubr.msk.f32.mxu0 %vm165_vm2, %v6038_v11  ;;  %v6555_v11 = vld [vmem:[%s7657_s0 + $0x130] sm:$0xff] }
  0xdd   :  { %2114 = vrot.lane.b32.xlu1 %v1999_v58, %s5753_s23  ;;  %v6739_v58 = vld [vmem:[%s7660_s3] ss:$0 sm:$0xff] }
  0xde   :  { %2112 = vrot.lane.b32.xlu0 %v1998_v4, %s5753_s23 }
  0xdf   :  { %5124 = vmatmul.mubr.msk.f32.gmra.mrb[12].mxu0 %vm165_vm2, %v6065_v33  ;;  %v1981_v33 = vld [vmem:[%s7658_s1 + $0x88] sm:$0x3] }
  0xe0   :  { %5126 = vmatprep.mubr.msk.f32.mxu0 %vm165_vm2, %v6282_v45  ;;  %v1980_v45 = vld [vmem:[%s7658_s1 + $0x80] sm:$0xff] }
  0xe1   :  { %2078 = vrot.lane.b32.xlu1 %v1981_v33, %s5753_s23 }
  0xe2   :  { %2076 = vrot.lane.b32.xlu0 %v1980_v45, %s5753_s23 }
  0xe3   :  { %5127 = vmatmul.mubr.msk.f32.gmra.mrb[14].mxu0 %vm165_vm2, %v6555_v11 }
  0xe4   :  { %5131 = vmatprep.mubr.msk.f32.mxu0 %vm165_vm2, %v5904_v27  ;;  %v54_v27 = vld [vmem:[%s7657_s0 + $0x98] sm:$0x3] }
  0xe5   :  { %2118 = vrot.lane.b32.xlu1 %v2001_v53, %s5753_s23  ;;  %v1465_v55 = vrot.slane %v54_v27, 1 }
  0xe6   :  { %2116 = vrot.lane.b32.xlu0 %v2000_v46, %s5753_s23 }
  0xe7   :  { %5132 = vmatmul.mubr.msk.f32.vlgmr.msra.gmra.mrb[0].mxu0 %vm165_vm2, %v5915_v29  ;;  %v1983_v29 = vld [vmem:[%s7658_s1 + $0x98] sm:$0x3] }
  0xe8   :  { %5156 = vmatpush3.msk.msra.mxu0 %vm198_vm0, %v83_v51  ;;  %5134 = vmatprep.mubr.msk.f32.mxu0 %vm165_vm2, %v5920_v32  ;;  %v1464_v32 = vrot.slane %v6502_v26, 1 }
  0xe9   :  { %2082 = vrot.lane.b32.xlu1 %v1983_v29, %s5753_s23  ;;  %5447 = vmatprep.subr.bf16.mxu0 %v5754_v5 }
  0xea   :  { %2080 = vrot.lane.b32.xlu0 %v1982_v48, %s5753_s23 }
  0xeb   :  { %5135 = vmatmul.mubr.msk.f32.gmra.mrb[2].mxu0 %vm165_vm2, %v5947_v39  ;;  %v2002_v39 = vld [vmem:[%s7658_s1 + $0x130] sm:$0xff] }
  0xec   :  { %5137 = vmatprep.mubr.msk.f32.mxu0 %vm165_vm2, %v5952_v42  ;;  %v1466_v42 = vsel %vm116_vm1, %v1464_v32, %v1465_v55 }
  0xed   :  { %2122 = vrot.lane.b32.xlu1 %v2003_v57, %s5753_s23 }
  0xee   :  { %2120 = vrot.lane.b32.xlu0 %v2002_v39, %s5753_s23 }
  0xef   :  { %5138 = vmatmul.mubr.msk.f32.gmra.mrb[4].mxu0 %vm165_vm2, %v5983_v50  ;;  %v74_v50 = vld [vmem:[%s7657_s0 + $0x138] sm:$0x3] }
  0xf0   :  { %5140 = vmatprep.mubr.msk.f32.mxu0 %vm165_vm2, %v6310_v17  ;;  %v1467_v17 = vrot.slane %v6555_v11, 1  ;;  %v1468_v59 = vrot.slane %v74_v50, 1 }
  0xf3   :  { %5141 = vmatmul.mubr.msk.f32.gmra.mrb[6].mxu0 %vm165_vm2, %v1466_v42 }
  0xf4   :  { %5143 = vmatprep.mubr.msk.f32.mxu0 %vm165_vm2, %v6020_v63  ;;  %v1469_v63 = vsel %vm116_vm1, %v1467_v17, %v1468_v59 }
  0xf7   :  { %5144 = vmatmul.mubr.msk.f32.gmra.mrb[8].mxu0 %vm165_vm2, %v6050_v16  ;;  %v1638_v16 = vrot.slane %v6502_v26, 2 }
  0xf8   :  { %5146 = vmatprep.mubr.msk.f32.mxu0 %vm165_vm2, %v6058_v23  ;;  %v1639_v23 = vrot.slane %v54_v27, 2 }
  0xfb   :  { %5147 = vmatmul.mubr.msk.f32.gmra.mrb[10].mxu0 %vm165_vm2, %v6077_v38  ;;  %v1640_v38 = vsel %vm527_vm3, %v1638_v16, %v1639_v23 }
  0xfc   :  { %5149 = vmatprep.mubr.msk.f32.mxu0 %vm165_vm2, %v6082_v43  ;;  %v1641_v43 = vrot.slane %v6555_v11, 2 }
  0xff   :  { %5150 = vmatmul.mubr.msk.f32.gmra.mrb[12].mxu0 %vm165_vm2, %v6089_v44  ;;  %v1642_v44 = vrot.slane %v74_v50, 2 }
 0x100   :  { %5152 = vmatprep.mubr.msk.f32.mxu0 %vm165_vm2, %v6336_v31 }
 0x103   :  { %5153 = vmatmul.mubr.msk.f32.gmra.mrb[14].mxu0 %vm165_vm2, %v1469_v63 }
 0x104   :  { %5157 = vmatprep.mubr.msk.f32.mxu0 %vm165_vm2, %v6144_v62  ;;  %v1643_v62 = vsel %vm527_vm3, %v1641_v43, %v1642_v44 }
 0x107   :  { %5158 = vmatmul.mubr.msk.f32.vlgmr.msra.gmra.mrb[0].mxu0 %vm165_vm2, %v6157_v15  ;;  %v6668_v15 = vpop.permute.xlu1 %2048 }
 0x108   :  { %5160 = vmatprep.mubr.msk.f32.mxu0 %vm165_vm2, %v6162_v20  ;;  %v2045_v20 = vpop.permute.xlu0 %2044  ;;  %5449 = vmatpush3.bf16.msra.mxu0 %v5448_v8 }
 0x109   :  { %v6744_v33 = vsel %vm2164_vm5, 0.0, %v2045_v20 }
 0x10a   :  { %v2206_v48 = vsel %vm2205_vm6, %v6744_v33, 0.0 }
 0x10b   :  { %5161 = vmatmul.mubr.msk.f32.gmra.mrb[2].mxu0 %vm165_vm2, %v6172_v30 }
 0x10c   :  { %5163 = vmatprep.mubr.msk.f32.mxu0 %vm165_vm2, %v6177_v40  ;;  %v2047_v40 = vpop.permute.xlu0 %2046 }
 0x10d   :  { %v6756_v39 = vsel %vm2164_vm5, 0.0, %v2047_v40 }
 0x10e   :  { %v2226_v59 = vsel %vm2225_vm7, %v6756_v39, 0.0 }
 0x10f   :  { %5164 = vmatmul.mubr.msk.f32.gmra.mrb[4].mxu0 %vm165_vm2, %v6184_v28 }
 0x110   :  { %5166 = vmatprep.mubr.msk.f32.mxu0 %vm165_vm2, %v6391_v2 }
 0x113   :  { %5167 = vmatmul.mubr.msk.f32.gmra.mrb[6].mxu0 %vm165_vm2, %v1640_v38 }
 0x114   :  { %5169 = vmatprep.mubr.msk.f32.mxu0 %vm165_vm2, %v6200_v54  ;;  %v6672_v54 = vpop.permute.xlu0 %2084 }
 0x115   :  { %v6768_v44 = vsel %vm2164_vm5, 0.0, %v6672_v54 }
 0x116   :  { %7684 = vst [vmem:[#allocation3_spill] sm:$0xff] %v6768_v44 }
 0x117   :  { %5170 = vmatmul.mubr.msk.f32.gmra.mrb[8].mxu0 %vm165_vm2, %v6209_v22  ;;  %v6670_v30 = vpop.permute.xlu1 %2050 }
 0x118   :  { %5172 = vmatprep.mubr.msk.f32.mxu0 %vm165_vm2, %v6214_v61  ;;  %v6676_v61 = vpop.permute.xlu0 %2088 }
 0x11b   :  { %5173 = vmatmul.mubr.msk.f32.gmra.mrb[10].mxu0 %vm165_vm2, %v6223_v7  ;;  %v2087_v28 = vpop.permute.xlu1 %2086 }
 0x11c   :  { %5175 = vmatprep.mubr.msk.f32.mxu0 %vm165_vm2, %v6228_v3  ;;  %v6680_v3 = vpop.permute.xlu0 %2052  ;;  %v6753_v32 = vsel %vm2164_vm5, 0.0, %v2087_v28 }
 0x11d   :  { %7683 = vst [vmem:[#allocation2_spill] sm:$0xff] %v6753_v32  ;;  %v6764_v43 = vsel %vm2225_vm7, %v6753_v32, 0.0 }
 0x11f   :  { %5176 = vmatmul.mubr.msk.f32.gmra.mrb[12].mxu0 %vm165_vm2, %v6235_v12  ;;  %v6674_v22 = vpop.permute.xlu1 %2090 }
 0x120   :  { %5178 = vmatprep.mubr.msk.f32.mxu0 %vm165_vm2, %v6444_v18  ;;  %v6684_v31 = vpop.permute.xlu0 %2092  ;;  %v5756_v18 = vmov 0.0  }
 0x121   :  { %5192 = vmatprep.mubr.msk.f32.mxu1 %vm5755_vm4, %v5756_v18 }
 0x123   :  { %5179 = vmatmul.mubr.msk.f32.gmra.mrb[14].mxu0 %vm165_vm2, %v1643_v62  ;;  %v6678_v7 = vpop.permute.xlu1 %2054 }
 0x124   :  { %v6688_v0 = vpop.permute.xlu0 %2056  ;;  %5185 = vmatprep.mubr.msk.f32.mxu0 %vm5755_vm4, %v5756_v18 }
 0x127   :  { %v6682_v12 = vpop.permute.xlu1 %2094 }
 0x128   :  { %v6698_v21 = vpop.permute.xlu0 %2096 }
 0x12b   :  { %v6686_v2 = vpop.permute.xlu1 %2058 }
 0x12c   :  { %v6702_v25 = vpop.permute.xlu0 %2060 }
 0x12f   :  { %v6696_v10 = vpop.permute.xlu1 %2098 }
 0x130   :  { %v6706_v41 = vpop.permute.xlu0 %2100 }
 0x133   :  { %v6700_v13 = vpop.permute.xlu1 %2062 }
 0x137   :  { %v6704_v60 = vpop.permute.xlu1 %2102 }
 0x13b   :  { %v6708_v51 = vpop.permute.xlu1 %2066 }
 0x13c   :  { %v6710_v1 = vpop.permute.xlu0 %2064 }
 0x13f   :  { %v6712_v36 = vpop.permute.xlu1 %2106 }
 0x140   :  { %v6714_v9 = vpop.permute.xlu0 %2104 }
 0x143   :  { %v6716_v14 = vpop.permute.xlu1 %2070 }
 0x144   :  { %v6718_v19 = vpop.permute.xlu0 %2068 }
 0x147   :  { %v6720_v24 = vpop.permute.xlu1 %2110 }
 0x148   :  { %v6722_v26 = vpop.permute.xlu0 %2108 }
 0x14b   :  { %v6724_v35 = vpop.permute.xlu1 %2074 }
 0x14c   :  { %v6726_v6 = vpop.permute.xlu0 %2072 }
 0x14f   :  { %v6728_v49 = vpop.permute.xlu1 %2114 }
 0x150   :  { %v6730_v37 = vpop.permute.xlu0 %2112 }
 0x153   :  { %v6732_v47 = vpop.permute.xlu1 %2078 }
 0x154   :  { %v6734_v56 = vpop.permute.xlu0 %2076 }
 0x157   :  { %v6741_v11 = vpop.permute.xlu1 %2118 }
 0x158   :  { %v6747_v46 = vpop.permute.xlu0 %2116 }
 0x15b   :  { %v2083_v38 = vpop.permute.xlu1 %2082 }
 0x15c   :  { %v2081_v40 = vpop.permute.xlu0 %2080 }
 0x1da   :  { %v5159_v4 = vpop.f32.mrb[0].mxu0 }
 0x1db   :  { %v1820_v45 = vadd.f32 %v5159_v4, %v6739_v58  ;;  %v1717_v53 = vpop.f32.mrb[1].mxu0 }
 0x1dc   :  { %v1819_v27 = vadd.f32 %v6739_v58, %v1717_v53 }
 0x1dd   :  { %vm1836_vm8 = vcmp.ge.f32.partialorder %v1820_v45, 0.0  ;;  %v1852_v29 = vmul.f32 0.01, %v1820_v45 }
 0x1de   :  { %vm1835_vm9 = vcmp.ge.f32.partialorder %v1819_v27, 0.0  ;;  %v1851_v55 = vmul.f32 0.01, %v1819_v27  ;;  %v5162_v57 = vpop.f32.mrb[2].mxu0 }
 0x1df   :  { %v1868_v42 = vsel %vm1836_vm8, %v1820_v45, %v1852_v29  ;;  %v1822_v50 = vadd.f32 %v5162_v57, %v6739_v58  ;;  %v1727_v17 = vpop.f32.mrb[3].mxu0  ;;  %v6775_v45 = vsel %vm2164_vm5, 0.0, %v2083_v38  ;;  %v6790_v29 = vsel %vm2164_vm5, 0.0, %v2081_v40  ;;  %v2123_v38 = vpop.permute.xlu1 %2122 }
 0x1e0   :  { %v1900_v63 = vrot.slane %v1868_v42, 7  ;;  %v1867_v16 = vsel %vm1835_vm9, %v1819_v27, %v1851_v55  ;;  %v1821_v23 = vadd.f32 %v6739_v58, %v1727_v17  ;;  %7685 = vst [vmem:[#allocation4_spill] sm:$0xff] %v6775_v45  ;;  %7687 = vst [vmem:[#allocation6_spill] sm:$0xff] %v6790_v29 }
 0x1e1   :  { %v1899_v62 = vrot.slane %v1867_v16, 7  ;;  %v1854_v20 = vmul.f32 0.01, %v1822_v50  ;;  %vm1838_vm11 = vcmp.ge.f32.partialorder %v1822_v50, 0.0 }
 0x1e2   :  { %v1933_v28 = vsel %vm1931_vm10, 0.0, %v1900_v63  ;;  %v1949_v5 = vsel %vm1931_vm10, %v1900_v63, 0.0  ;;  %v1853_v34 = vmul.f32 0.01, %v1821_v23  ;;  %v5165_v52 = vpop.f32.mrb[4].mxu0  ;;  %vm1837_vm12 = vcmp.ge.f32.partialorder %v1821_v23, 0.0 }
 0x1e3   :  { %v1932_v8 = vsel %vm1931_vm10, 0.0, %v1899_v62  ;;  %v1948_v18 = vsel %vm1931_vm10, %v1899_v62, 0.0  ;;  %v1737_v4 = vpop.f32.mrb[5].mxu0  ;;  %v6779_v54 = vsel %vm2164_vm5, %v1949_v5, %v6678_v7  ;;  %v6794_v55 = vsel %vm2164_vm5, %v1933_v28, %v6680_v3 }
 0x1e4   :  { %7686 = vst [vmem:[#allocation5_spill] sm:$0xff] %v6779_v54  ;;  %v6783_v53 = vsel %vm2164_vm5, %v1932_v8, %v6668_v15  ;;  %v6787_v27 = vsel %vm2164_vm5, %v1948_v18, %v6670_v30  ;;  %7688 = vst [vmem:[#allocation7_spill] sm:$0xff] %v6794_v55  ;;  %v1870_v42 = vsel %vm1838_vm11, %v1822_v50, %v1854_v20  ;;  %v2229_v62 = vsel %vm2225_vm7, %v6779_v54, 0.0 }
 0x1e5   :  { %v2207_v57 = vsel %vm2205_vm6, %v6783_v53, 0.0  ;;  %v2227_v7 = vsel %vm2225_vm7, %v6787_v27, 0.0  ;;  %v1902_v63 = vrot.slane %v1870_v42, 7  ;;  %v1869_v16 = vsel %vm1837_vm12, %v1821_v23, %v1853_v34 }
 0x1e6   :  { %v2208_v15 = vadd.f32 %v2207_v57, %v2206_v48  ;;  %v2228_v17 = vadd.f32 %v2227_v7, %v2226_v59  ;;  %v5168_v30 = vpop.f32.mrb[6].mxu0  ;;  %v1901_v40 = vrot.slane %v1869_v16, 7  ;;  %v1824_v3 = vadd.f32 %v5165_v52, %v6739_v58 }
 0x1e7   :  { %v1823_v28 = vadd.f32 %v6739_v58, %v1737_v4  ;;  %v1747_v5 = vpop.f32.mrb[7].mxu0  ;;  %v6806_v8 = vsel %vm2205_vm6, %v6768_v44, 0.0  ;;  %v1826_v48 = vadd.f32 %v5168_v30, %v6739_v58  ;;  %v6811_v59 = vsel %vm2225_vm7, %v6775_v45, 0.0 }
 0x1e8   :  { %v2230_v50 = vadd.f32 %v2229_v62, %v2228_v17  ;;  %v2209_v23 = vsel %vm2205_vm6, %v6794_v55, 0.0  ;;  %v1950_v20 = vsel %vm1931_vm10, %v1901_v40, 0.0  ;;  %v6818_v34 = vsel %vm2205_vm6, %v6790_v29, 0.0 }
 0x1e9   :  { %v6821_v52 = vsel %vm2164_vm5, 0.0, %v2123_v38  ;;  %v6823_v18 = vadd.f32 %v2209_v23, %v2208_v15  ;;  %v1951_v4 = vsel %vm1931_vm10, %v1902_v63, 0.0  ;;  %v6828_v57 = vsel %vm2164_vm5, %v1950_v20, %v6686_v2 }
 0x1ea   :  { %7689 = vst [vmem:[#allocation8_spill] sm:$0xff] %v6828_v57  ;;  %vm1840_vm13 = vcmp.ge.f32.partialorder %v1824_v3, 0.0  ;;  %v5171_v7 = vpop.f32.mrb[8].mxu0  ;;  %v2231_v42 = vsel %vm2225_vm7, %v6828_v57, 0.0  ;;  %v1856_v17 = vmul.f32 0.01, %v1824_v3  ;;  %v1825_v15 = vadd.f32 %v6739_v58, %v1747_v5 }
 0x1eb   :  { %vm1839_vm14 = vcmp.ge.f32.partialorder %v1823_v28, 0.0  ;;  %v1855_v16 = vmul.f32 0.01, %v1823_v28  ;;  %v2232_v30 = vadd.f32 %v2231_v42, %v2230_v50  ;;  %vm1842_vm15 = vcmp.ge.f32.partialorder %v1826_v48, 0.0  ;;  %v1757_v62 = vpop.f32.mrb[9].mxu0 }
 0x1ec   :  { %v1858_v38 = vmul.f32 0.01, %v1826_v48  ;;  %v6835_v23 = vsel %vm2164_vm5, %v1951_v4, %v6700_v13  ;;  %v1872_v2 = vsel %vm1840_vm13, %v1824_v3, %v1856_v17  ;;  %v1828_v45 = vadd.f32 %v5171_v7, %v6739_v58 }
 0x1ed   :  { %7690 = vst [vmem:[#allocation9_spill] sm:$0xff] %v6835_v23  ;;  %v1871_v20 = vsel %vm1839_vm14, %v1823_v28, %v1855_v16  ;;  %v1904_v29 = vrot.slane %v1872_v2, 7  ;;  %vm1841_vm0 = vcmp.ge.f32.partialorder %v1825_v15, 0.0  ;;  %v1857_v50 = vmul.f32 0.01, %v1825_v15 }
 0x1ee   :  { %v1903_v44 = vrot.slane %v1871_v20, 7  ;;  %v1874_v32 = vsel %vm1842_vm15, %v1826_v48, %v1858_v38  ;;  %v5174_v57 = vpop.f32.mrb[10].mxu0  ;;  %vm1844_vm2 = vcmp.ge.f32.partialorder %v1828_v45, 0.0  ;;  %v1860_v42 = vmul.f32 0.01, %v1828_v45 }
 0x1ef   :  { %v1906_v54 = vrot.slane %v1874_v32, 7  ;;  %v1935_v5 = vsel %vm1931_vm10, 0.0, %v1902_v63  ;;  %v1934_v55 = vsel %vm1931_vm10, 0.0, %v1901_v40  ;;  %v1953_v13 = vsel %vm1931_vm10, %v1904_v29, 0.0  ;;  %v1767_v28 = vpop.f32.mrb[11].mxu0 }
 0x1f0   :  { %v1952_v3 = vsel %vm1931_vm10, %v1903_v44, 0.0  ;;  %v2233_v4 = vsel %vm2225_vm7, %v6835_v23, 0.0  ;;  %v1937_v48 = vsel %vm1931_vm10, 0.0, %v1904_v29  ;;  %v1936_v7 = vsel %vm1931_vm10, 0.0, %v1903_v44 }
 0x1f1   :  { %v6848_v32 = vsel %vm2164_vm5, %v1952_v3, %v6708_v51  ;;  %v6852_v63 = vsel %vm2164_vm5, %v1953_v13, %v6716_v14  ;;  %v1873_v40 = vsel %vm1841_vm0, %v1825_v15, %v1857_v50  ;;  %v1876_v17 = vsel %vm1844_vm2, %v1828_v45, %v1860_v42 }
 0x1f2   :  { %v1955_v16 = vsel %vm1931_vm10, %v1906_v54, 0.0  ;;  %v5177_v38 = vpop.f32.mrb[12].mxu0  ;;  %v1905_v2 = vrot.slane %v1873_v40, 7  ;;  %v1908_v20 = vrot.slane %v1876_v17, 7  ;;  %v2234_v44 = vadd.f32 %v2233_v4, %v2232_v30 }
 0x1f3   :  { %v6858_v29 = vsel %vm2164_vm5, %v1955_v16, %v6732_v47  ;;  %v6860_v23 = vpop.f32.mrb[13].mxu0  ;;  %v6864_v51 = vsel %vm2164_vm5, %v1935_v5, %v6702_v25  ;;  %v6868_v14 = vsel %vm2164_vm5, %v1934_v55, %v6688_v0  ;;  %v2235_v45 = vsel %vm2225_vm7, %v6848_v32, 0.0 }
 0x1f4   :  { %v1827_v15 = vadd.f32 %v6739_v58, %v1757_v62  ;;  %v6875_v47 = vsel %vm2164_vm5, %v1937_v48, %v6718_v19  ;;  %v6879_v30 = vsel %vm2164_vm5, %v1936_v7, %v6710_v1  ;;  %v1954_v25 = vsel %vm1931_vm10, %v1905_v2, 0.0 }
 0x1f5   :  { %v1941_v50 = vsel %vm1931_vm10, 0.0, %v1908_v20  ;;  %v6885_v0 = vsel %vm2164_vm5, %v1954_v25, %v6724_v35  ;;  %v1957_v55 = vsel %vm1931_vm10, %v1908_v20, 0.0  ;;  %v2237_v62 = vsel %vm2225_vm7, %v6852_v63, 0.0 }
 0x1f6   :  { %v2241_v19 = vsel %vm2225_vm7, %v6858_v29, 0.0  ;;  %v6892_v42 = vpop.f32.mrb[14].mxu0  ;;  %v1938_v1 = vsel %vm1931_vm10, 0.0, %v1905_v2  ;;  %v6897_v5 = vsel %vm2164_vm5, %v1941_v50, %v6684_v31  ;;  %v2236_v13 = vadd.f32 %v2235_v45, %v2234_v44 }
 0x1f7   :  { %v2239_v35 = vsel %vm2225_vm7, %v6885_v0, 0.0  ;;  %v6901_v3 = vpop.f32.mrb[15].mxu0  ;;  %v1939_v4 = vsel %vm1931_vm10, 0.0, %v1906_v54  ;;  %vm1843_vm4 = vcmp.ge.f32.partialorder %v1827_v15, 0.0  ;;  %v1859_v48 = vmul.f32 0.01, %v1827_v15 }
 0x1f8   :  { %v1830_v7 = vadd.f32 %v5174_v57, %v6739_v58  ;;  %v6907_v40 = vsel %vm2164_vm5, %v1957_v55, %v6682_v12  ;;  %v2238_v17 = vadd.f32 %v2237_v62, %v2236_v13  ;;  %v1829_v31 = vadd.f32 %v6739_v58, %v1767_v28 }
 0x1f9   :  { %v1832_v16 = vadd.f32 %v5177_v38, %v6739_v58  ;;  %v6913_v2 = vsel %vm2164_vm5, %v1939_v4, %v6734_v56  ;;  %v1875_v20 = vsel %vm1843_vm4, %v1827_v15, %v1859_v48  ;;  %v2211_v50 = vsel %vm2205_vm6, %v6868_v14, 0.0 }
 0x1fa   :  { %vm1846_vm8 = vcmp.ge.f32.partialorder %v1830_v7, 0.0  ;;  %v1862_v54 = vmul.f32 0.01, %v1830_v7  ;;  %v2240_v44 = vadd.f32 %v2239_v35, %v2238_v17  ;;  %v1907_v45 = vrot.slane %v1875_v20, 7 }
 0x1fb   :  { %vm1845_vm9 = vcmp.ge.f32.partialorder %v1829_v31, 0.0  ;;  %v1861_v57 = vmul.f32 0.01, %v1829_v31  ;;  %vm1848_vm11 = vcmp.ge.f32.partialorder %v1832_v16, 0.0  ;;  %v1864_v12 = vmul.f32 0.01, %v1832_v16 }
 0x1fc   :  { %v1878_v25 = vsel %vm1846_vm8, %v1830_v7, %v1862_v54  ;;  %v2242_v28 = vadd.f32 %v2241_v19, %v2240_v44  ;;  %v1940_v38 = vsel %vm1931_vm10, 0.0, %v1907_v45  ;;  %v1956_v55 = vsel %vm1931_vm10, %v1907_v45, 0.0 }
 0x1fd   :  { %v1910_v56 = vrot.slane %v1878_v25, 7  ;;  %v6921_v15 = vsel %vm2164_vm5, %v1940_v38, %v6676_v61  ;;  %v6925_v62 = vsel %vm2164_vm5, %v1956_v55, %v6674_v22  ;;  %v1877_v13 = vsel %vm1845_vm9, %v1829_v31, %v1861_v57 }
 0x1fe   :  { %v1880_v35 = vsel %vm1848_vm11, %v1832_v16, %v1864_v12  ;;  %v2246_v4 = vsel %vm2205_vm6, %v6921_v15, 0.0  ;;  %v2265_v19 = vsel %vm2225_vm7, %v6925_v62, 0.0  ;;  %v6935_v61 = vsel %vm2164_vm5, %v1938_v1, %v6726_v6 }
 0x1ff   :  { %v1943_v48 = vsel %vm1931_vm10, 0.0, %v1910_v56  ;;  %v1959_v7 = vsel %vm1931_vm10, %v1910_v56, 0.0  ;;  %v2247_v17 = vadd.f32 %v2246_v4, %v6806_v8  ;;  %v2266_v22 = vadd.f32 %v2265_v19, %v6764_v43 }
 0x200   :  { %v6941_v31 = vsel %vm2164_vm5, %v1959_v7, %v6704_v60  ;;  %v2248_v16 = vsel %vm2205_vm6, %v6897_v5, 0.0  ;;  %v2267_v20 = vsel %vm2225_vm7, %v6907_v40, 0.0  ;;  %v1909_v54 = vrot.slane %v1877_v13, 7 }
 0x201   :  { %v1912_v44 = vrot.slane %v1880_v35, 7  ;;  %v2221_v6 = vsel %vm2205_vm6, %v6913_v2, 0.0  ;;  %v6951_v8 = vsel %vm2164_vm5, %v1943_v48, %v6706_v41  ;;  %v2268_v43 = vadd.f32 %v2267_v20, %v2266_v22 }
 0x202   :  { %v2212_v1 = vadd.f32 %v2211_v50, %v6823_v18  ;;  %v2271_v60 = vsel %vm2225_vm7, %v6941_v31, 0.0  ;;  %v1942_v45 = vsel %vm1931_vm10, 0.0, %v1909_v54  ;;  %v1958_v57 = vsel %vm1931_vm10, %v1909_v54, 0.0 }
 0x203   :  { %v2244_v25 = vadd.f32 %v6811_v59, %v2242_v28  ;;  %v2249_v12 = vadd.f32 %v2248_v16, %v2247_v17  ;;  %v6961_v38 = vsel %vm2164_vm5, %v1958_v57, %v6696_v10  ;;  %v1945_v41 = vsel %vm1931_vm10, 0.0, %v1912_v44 }
 0x204   :  { %v2213_v55 = vsel %vm2205_vm6, %v6864_v51, 0.0  ;;  %v6968_v18 = vsel %vm2164_vm5, %v1942_v45, %v6698_v21  ;;  %v2269_v50 = vsel %vm2225_vm7, %v6961_v38, 0.0  ;;  %v2215_v59 = vsel %vm2205_vm6, %v6879_v30, 0.0 }
 0x205   :  { %v2214_v56 = vadd.f32 %v2213_v55, %v2212_v1  ;;  %v2270_v28 = vadd.f32 %v2269_v50, %v2268_v43  ;;  %v1961_v10 = vsel %vm1931_vm10, %v1912_v44, 0.0  ;;  %v2217_v13 = vsel %vm2205_vm6, %v6875_v47, 0.0 }
 0x206   :  { %v1831_v35 = vadd.f32 %v6739_v58, %v6860_v23  ;;  %v2219_v21 = vsel %vm2205_vm6, %v6935_v61, 0.0  ;;  %v1834_v19 = vadd.f32 %v6892_v42, %v6739_v58  ;;  %v1833_v48 = vadd.f32 %v6739_v58, %v6901_v3 }
 0x207   :  { %v2216_v4 = vadd.f32 %v2215_v59, %v2214_v56  ;;  %v2272_v17 = vadd.f32 %v2271_v60, %v2270_v28  ;;  %v2250_v22 = vsel %vm2205_vm6, %v6968_v18, 0.0  ;;  %v6989_v23 = vsel %vm2164_vm5, %v1945_v41, %v6722_v26 }
 0x208   :  { %vm1847_vm12 = vcmp.ge.f32.partialorder %v1831_v35, 0.0  ;;  %v1863_v7 = vmul.f32 0.01, %v1831_v35  ;;  %vm1850_vm13 = vcmp.ge.f32.partialorder %v1834_v19, 0.0  ;;  %v1866_v20 = vmul.f32 0.01, %v1834_v19 }
 0x209   :  { %v2218_v16 = vadd.f32 %v2217_v13, %v2216_v4  ;;  %vm1849_vm14 = vcmp.ge.f32.partialorder %v1833_v48, 0.0  ;;  %v1865_v44 = vmul.f32 0.01, %v1833_v48  ;;  %v2251_v42 = vadd.f32 %v2250_v22, %v2249_v12 }
 0x20a   :  { %v1879_v54 = vsel %vm1847_vm12, %v1831_v35, %v1863_v7  ;;  %v6993_v58 = vsel %vm2164_vm5, %v1961_v10, %v6720_v24  ;;  %v1882_v1 = vsel %vm1850_vm13, %v1834_v19, %v1866_v20  ;;  %v2284_v60 = vsel %vm2225_vm7, %v2244_v25, 0.0 }
 0x20b   :  { %v2220_v3 = vadd.f32 %v2219_v21, %v2218_v16  ;;  %v1911_v43 = vrot.slane %v1879_v54, 7  ;;  %v1914_v45 = vrot.slane %v1882_v1, 7  ;;  %v1881_v57 = vsel %vm1849_vm14, %v1833_v48, %v1865_v44  ;;  %v2121_v21 = vpop.permute.xlu0 %2120 }
 0x20c   :  { %v2252_v55 = vsel %vm2205_vm6, %v6951_v8, 0.0  ;;  %v1913_v12 = vrot.slane %v1881_v57, 7  ;;  %v2275_v13 = vsel %vm2225_vm7, %v6993_v58, 0.0  ;;  %v7035_v20 = vsel %vm2164_vm5, 0.0, %v2121_v21 }
 0x20d   :  { %v2222_v50 = vadd.f32 %v2221_v6, %v2220_v3  ;;  %v1944_v26 = vsel %vm1931_vm10, 0.0, %v1911_v43  ;;  %v1960_v41 = vsel %vm1931_vm10, %v1911_v43, 0.0  ;;  %v1963_v25 = vsel %vm1931_vm10, %v1914_v45, 0.0 }
 0x20e   :  { %v7002_v24 = vsel %vm2164_vm5, %v1944_v26, %v6714_v9  ;;  %v7006_v56 = vsel %vm2164_vm5, %v1960_v41, %v6712_v36  ;;  %v2253_v59 = vadd.f32 %v2252_v55, %v2251_v42  ;;  %v1946_v10 = vsel %vm1931_vm10, 0.0, %v1913_v12 }
 0x20f   :  { %v2224_v28 = vadd.f32 %v6818_v34, %v2222_v50  ;;  %v2273_v6 = vsel %vm2225_vm7, %v7006_v56, 0.0  ;;  %v1947_v9 = vsel %vm1931_vm10, 0.0, %v1914_v45  ;;  %v1962_v35 = vsel %vm1931_vm10, %v1913_v12, 0.0 }
 0x210   :  { %v7019_v36 = vsel %vm2164_vm5, %v1946_v10, %v6730_v37  ;;  %v2274_v4 = vadd.f32 %v2273_v6, %v2272_v17  ;;  %v7024_v19 = vsel %vm2164_vm5, %v1962_v35, %v6728_v49  ;;  %v7028_v48 = vsel %vm2164_vm5, %v1963_v25, %v6741_v11 }
 0x211   :  { %v2283_v34 = vsel %vm2205_vm6, %v2224_v28, 0.0  ;;  %v2254_v7 = vsel %vm2205_vm6, %v7002_v24, 0.0  ;;  %v2277_v37 = vsel %vm2225_vm7, %v7024_v19, 0.0  ;;  %v2256_v49 = vsel %vm2205_vm6, %v6989_v23, 0.0 }
 0x212   :  { %v2285_v22 = vadd.f32 %v2284_v60, %v2283_v34  ;;  %v2276_v16 = vadd.f32 %v2275_v13, %v2274_v4  ;;  %v2255_v17 = vadd.f32 %v2254_v7, %v2253_v59  ;;  %v2258_v54 = vsel %vm2205_vm6, %v7019_v36, 0.0 }
 0x213   :  { %v7043_v44 = vsel %vm2164_vm5, %v1947_v9, %v6747_v46  ;;  %v2279_v43 = vsel %vm2225_vm7, %v7028_v48, 0.0  ;;  %v2281_v1 = vsel %vm2225_vm7, %v6821_v52, 0.0  ;;  %v2262_v50 = vsel %vm2205_vm6, %v7035_v20, 0.0 }
 0x214   :  { %v2286_v11 = vrot.slane %v2285_v22, 4  ;;  %v2278_v42 = vadd.f32 %v2277_v37, %v2276_v16  ;;  %v2257_v3 = vadd.f32 %v2256_v49, %v2255_v17  ;;  %v2260_v55 = vsel %vm2205_vm6, %v7043_v44, 0.0  ;;  %v2391_v17 = vld [vmem:[%s7661_s8] sm:$0xff]  ;;  %v2392_v49 = vld [vmem:[%s7661_s8 + $0x8] sm:$0xff] }
 0x215   :  { %vm2314_vm5 = vcmask 1041409   ;;  %vm2475_vm10 = vcmask 58368  }
 0x216   :  { %v2280_v60 = vadd.f32 %v2279_v43, %v2278_v42  ;;  %v2259_v45 = vadd.f32 %v2258_v54, %v2257_v3  ;;  %v2287_v57 = vadd.f32 %v2286_v11, %v2285_v22  ;;  %v5451_v54 = vpack.c.bf16 %v2392_v49, %v2391_v17  ;;  %v2492_v11 = vld [vmem:[%s7662_s4 + $0x10] sm:$0xff]  ;;  %v2493_v42 = vld [vmem:[%s7662_s4 + $0x18] sm:$0xff]  ;;  %v4477_v43 = vld [vmem:[%s7663_s7] ss:$0 sm:$0xff] }
 0x217   :  { %v5453_v3 = vpack.c.bf16 %v2493_v42, %v2492_v11  ;;  %v2552_v17 = vrot.slane %v6864_v51, 1  ;;  %v7694_v49 = vld [vmem:[#allocation9_spill] sm:$0xff]  ;;  %v2555_v42 = vrot.slane %v6879_v30, 1 }
 0x218   :  { %v2282_v26 = vadd.f32 %v2281_v1, %v2280_v60  ;;  %v2261_v46 = vadd.f32 %v2260_v55, %v2259_v45  ;;  %v2288_v25 = vrot.slane %v2287_v57, 2  ;;  %5452 = vmatpush3.bf16.msra.mxu1 %v5451_v54  ;;  %v2491_v55 = vld [vmem:[%s7662_s4 + $0x8] sm:$0xff]  ;;  %v2553_v54 = vrot.slane %v7694_v49, 1 }
 0x219   :  { %5454 = vmatprep.subr.bf16.mxu1 %v5453_v3 }
 0x21a   :  { %v2293_v41 = vsel %vm2225_vm7, %v2282_v26, 0.0  ;;  %v2263_v12 = vadd.f32 %v2262_v50, %v2261_v46  ;;  %v2289_v6 = vadd.f32 %v2288_v25, %v2287_v57  ;;  %v2490_v57 = vld [vmem:[%s7662_s4] sm:$0xff]  ;;  %v2540_v50 = vrot.slane %v6744_v33, 1 }
 0x21b   :  { %v2541_v26 = vrot.slane %v6756_v39, 1  ;;  %v2543_v25 = vrot.slane %v6783_v53, 1 }
 0x21c   :  { %v2292_v59 = vsel %vm2205_vm6, %v2263_v12, 0.0  ;;  %v2290_v9 = vrot.slane %v2289_v6, 1 }
 0x21d   :  { %v2294_v28 = vadd.f32 %v2293_v41, %v2292_v59  ;;  %v5457_v41 = vpack.c.bf16 %v2491_v55, %v2490_v57  ;;  %v2544_v59 = vrot.slane %v6787_v27, 1  ;;  %v2561_v57 = vrot.slane %v6935_v61, 1 }
 0x21e   :  { %v2291_v34 = vadd.f32 %v2290_v9, %v2289_v6  ;;  %v2495_v6 = vld [vmem:[%s7662_s4 + $0x28] sm:$0xff]  ;;  %v2562_v55 = vrot.slane %v6885_v0, 1 }
 0x21f   :  { %v2295_v10 = vrot.slane %v2294_v28, 4 }
 0x220   :  { %v2301_v22 = vmul.f32 0.015625, %v2291_v34  ;;  %v7095_v34 = vsel %vm116_vm1, %v2543_v25, %v2544_v59  ;;  %v7138_v25 = vsel %vm116_vm1, %v2561_v57, %v2562_v55  ;;  %v2567_v59 = vrot.slane %v6921_v15, 1 }
 0x221   :  { %v2296_v13 = vadd.f32 %v2295_v10, %v2294_v28  ;;  %v2494_v28 = vld [vmem:[%s7662_s4 + $0x20] sm:$0xff]  ;;  %v2542_v10 = vsel %vm116_vm1, %v2540_v50, %v2541_v26  ;;  %v2582_v55 = vrot.slane %v6989_v23, 1 }
 0x222   :  { %v7695_v50 = vld [vmem:[#allocation2_spill] sm:$0xff] }
 0x223   :  { %v2297_v35 = vrot.slane %v2296_v13, 2  ;;  %v2565_v26 = vrot.slane %v7695_v50, 1 }
 0x225   :  { %v2298_v4 = vadd.f32 %v2297_v35, %v2296_v13  ;;  %v7691_v13 = vld [vmem:[#allocation7_spill] sm:$0xff]  ;;  %v7692_v35 = vld [vmem:[#allocation5_spill] sm:$0xff] }
 0x226   :  { %v2546_v9 = vrot.slane %v7691_v13, 1 }
 0x227   :  { %v2299_v21 = vrot.slane %v2298_v4, 1 }
 0x229   :  { %v2300_v7 = vadd.f32 %v2299_v21, %v2298_v4  ;;  %v2547_v4 = vrot.slane %v7692_v35, 1  ;;  %v7092_v21 = vpack.c.bf16 %v2495_v6, %v2494_v28  ;;  %v2568_v28 = vrot.slane %v6925_v62, 1 }
 0x22b   :  { %v2302_v16 = vmul.f32 0.015625, %v2300_v7  ;;  %v2549_v7 = vrot.slane %v6868_v14, 1 }
 0x22d   :  { %v2315_v37 = vsel %vm2314_vm5, %v2302_v16, %v2301_v22  ;;  %v7693_v22 = vld [vmem:[#allocation8_spill] sm:$0xff] }
 0x22e   :  { %5186 = vmatmul.mubr.msk.f32.vlgmr.msra.gmra.mrb[16].mxu0 %vm2205_vm6, %v2315_v37  ;;  %v2550_v16 = vrot.slane %v7693_v22, 1  ;;  %v7102_v37 = vsel %vm116_vm1, %v2546_v9, %v2547_v4  ;;  %v2571_v9 = vrot.slane %v6907_v40, 1  ;;  %v7149_v4 = vsel %vm116_vm1, %v2567_v59, %v2568_v28 }
 0x22f   :  { %v2585_v59 = vrot.slane %v7019_v36, 1  ;;  %v2586_v28 = vrot.slane %v7024_v19, 1 }
 0x230   :  { %v7110_v11 = vsel %vm116_vm1, %v2549_v7, %v2550_v16  ;;  %v2573_v7 = vrot.slane %v6968_v18, 1  ;;  %v2574_v16 = vrot.slane %v6961_v38, 1 }
 0x301   :  { %v2384_v1 = vpop.f32.mrb[16].mxu0 }
 0x302   :  { %v2385_v60 = vadd.f32 %v4477_v43, %v2384_v1  ;;  %v5187_v45 = vpop.f32.mrb[17].mxu0  ;;  %v7117_v43 = vsel %vm116_vm1, %v2552_v17, %v2553_v54  ;;  %v2558_v1 = vrot.slane %v6875_v47, 1  ;;  %v2576_v54 = vrot.slane %v6951_v8, 1 }
 0x304   :  { %vm2388_vm7 = vcmp.ge.f32.partialorder %v2385_v60, 0.0  ;;  %v2389_v46 = vmul.f32 0.01, %v2385_v60 }
 0x306   :  { %v2390_v12 = vsel %vm2388_vm7, %v2385_v60, %v2389_v46  ;;  %v2559_v60 = vrot.slane %v6852_v63, 1  ;;  %v7696_v46 = vld [vmem:[#allocation3_spill] sm:$0xff] }
 0x307   :  { %5193 = vmatmul.mubr.msk.f32.vlgmr.msra.gmra.mrb[0].mxu1 %vm2205_vm6, %v2390_v12 }
 0x308   :  { %5456 = vmatpush3.bf16.msra.mxu1 %v5453_v3  ;;  %5199 = vmatprep.mubr.msk.f32.mxu1 %vm2205_vm6, %v2542_v10  ;;  %v2556_v3 = vrot.slane %v6848_v32, 1  ;;  %v7133_v12 = vsel %vm116_vm1, %v2558_v1, %v2559_v60  ;;  %v2570_v10 = vrot.slane %v6897_v5, 1  ;;  %v2579_v1 = vrot.slane %v7002_v24, 1 }
 0x309   :  { %5458 = vmatprep.subr.bf16.mxu1 %v5457_v41  ;;  %v2580_v60 = vrot.slane %v7006_v56, 1 }
 0x30a   :  { %v7124_v45 = vsel %vm116_vm1, %v2555_v42, %v2556_v3  ;;  %v7156_v17 = vsel %vm116_vm1, %v2570_v10, %v2571_v9  ;;  %v2577_v42 = vrot.slane %v6941_v31, 1  ;;  %v7163_v3 = vsel %vm116_vm1, %v2573_v7, %v2574_v16  ;;  %v2496_v9 = vld [vmem:[%s7662_s4 + $0x30] sm:$0xff]  ;;  %v2497_v7 = vld [vmem:[%s7662_s4 + $0x38] sm:$0xff] }
 0x30b   :  { %5200 = vmatmul.mubr.msk.f32.vlgmr.msra.gmra.mrb[2].mxu1 %vm2205_vm6, %v7095_v34  ;;  %v7189_v10 = vsel %vm116_vm1, %v2585_v59, %v2586_v28  ;;  %v5465_v16 = vpack.c.bf16 %v2497_v7, %v2496_v9  ;;  %v2951_v28 = vrot.slane %v6868_v14, 2  ;;  %v2952_v9 = vrot.slane %v7693_v22, 2 }
 0x30c   :  { %5202 = vmatprep.mubr.msk.f32.mxu1 %vm2205_vm6, %v7102_v37  ;;  %5460 = vmatpush3.bf16.msra.mxu1 %v5457_v41  ;;  %v2564_v41 = vrot.slane %v7696_v46, 1  ;;  %v7170_v57 = vsel %vm116_vm1, %v2576_v54, %v2577_v42  ;;  %v2943_v54 = vrot.slane %v6756_v39, 2  ;;  %v2946_v42 = vrot.slane %v6787_v27, 2 }
 0x30d   :  { %5462 = vmatprep.subr.bf16.mxu1 %v7092_v21  ;;  %v2957_v22 = vrot.slane %v6879_v30, 2 }
 0x30e   :  { %v2566_v6 = vsel %vm116_vm1, %v2564_v41, %v2565_v26  ;;  %v2583_v26 = vrot.slane %v6993_v58, 1  ;;  %v7177_v41 = vsel %vm116_vm1, %v2579_v1, %v2580_v60  ;;  %v2945_v1 = vrot.slane %v6783_v53, 2  ;;  %v2498_v60 = vld [vmem:[%s7662_s4 + $0x40] sm:$0xff] }
 0x30f   :  { %5203 = vmatmul.mubr.msk.f32.gmra.mrb[4].mxu1 %vm2205_vm6, %v7110_v11 }
 0x310   :  { %5205 = vmatprep.mubr.msk.f32.mxu1 %vm2205_vm6, %v7117_v43  ;;  %v7249_v59 = vsel %vm527_vm3, %v2945_v1, %v2946_v42  ;;  %v2958_v42 = vrot.slane %v6848_v32, 2  ;;  %v2964_v32 = vrot.slane %v6885_v0, 2  ;;  %v2970_v0 = vrot.slane %v6925_v62, 2 }
 0x313   :  { %5206 = vmatmul.mubr.msk.f32.gmra.mrb[6].mxu1 %vm2205_vm6, %v7124_v45 }
 0x314   :  { %5208 = vmatprep.mubr.msk.f32.mxu1 %vm2205_vm6, %v7133_v12 }
 0x317   :  { %5209 = vmatmul.mubr.msk.f32.gmra.mrb[8].mxu1 %vm2205_vm6, %v7138_v25 }
 0x318   :  { %5211 = vmatprep.mubr.msk.f32.mxu1 %vm2205_vm6, %v2566_v6  ;;  %v7184_v6 = vsel %vm116_vm1, %v2582_v55, %v2583_v26  ;;  %v2948_v55 = vrot.slane %v7691_v13, 2  ;;  %v2949_v26 = vrot.slane %v7692_v35, 2  ;;  %v2955_v35 = vrot.slane %v7694_v49, 2 }
 0x319   :  { %v2960_v49 = vrot.slane %v6875_v47, 2 }
 0x31a   :  { %v7256_v7 = vsel %vm527_vm3, %v2948_v55, %v2949_v26  ;;  %v2966_v55 = vrot.slane %v7696_v46, 2 }
 0x31b   :  { %5212 = vmatmul.mubr.msk.f32.gmra.mrb[10].mxu1 %vm2205_vm6, %v7149_v4 }
 0x31c   :  { %5214 = vmatprep.mubr.msk.f32.mxu1 %vm2205_vm6, %v7156_v17 }
 0x31f   :  { %5215 = vmatmul.mubr.msk.f32.gmra.mrb[12].mxu1 %vm2205_vm6, %v7163_v3 }
 0x320   :  { %5217 = vmatprep.mubr.msk.f32.mxu1 %vm2205_vm6, %v7170_v57 }
 0x323   :  { %5218 = vmatmul.mubr.msk.f32.gmra.mrb[14].mxu1 %vm2205_vm6, %v7177_v41 }
 0x324   :  { %5220 = vmatprep.mubr.msk.f32.mxu1 %vm2205_vm6, %v7184_v6 }
 0x327   :  { %5221 = vmatmul.mubr.msk.f32.gmra.mrb[16].mxu1 %vm2205_vm6, %v7189_v10 }
 0x328   :  { %5227 = vmatprep.mubr.msk.f32.mxu1 %vm2205_vm6, %v6744_v33 }
 0x32b   :  { %5228 = vmatmul.mubr.msk.f32.vlgmr.msra.gmra.mrb[2].mxu1 %vm2205_vm6, %v6783_v53 }
 0x32c   :  { %5230 = vmatprep.mubr.msk.f32.mxu1 %vm2205_vm6, %v7691_v13  ;;  %5464 = vmatpush3.bf16.msra.mxu1 %v7092_v21  ;;  %v2942_v21 = vrot.slane %v6744_v33, 2  ;;  %v2499_v33 = vld [vmem:[%s7662_s4 + $0x48] sm:$0xff] }
 0x32d   :  { %5466 = vmatprep.subr.bf16.mxu1 %v5465_v16  ;;  %v7246_v27 = vpack.c.bf16 %v2499_v33, %v2498_v60  ;;  %v2961_v60 = vrot.slane %v6852_v63, 2  ;;  %v2963_v33 = vrot.slane %v6935_v61, 2 }
 0x32e   :  { %v2944_v39 = vsel %vm527_vm3, %v2942_v21, %v2943_v54  ;;  %v2954_v21 = vrot.slane %v6864_v51, 2  ;;  %v7264_v54 = vsel %vm527_vm3, %v2951_v28, %v2952_v9  ;;  %v2969_v28 = vrot.slane %v6921_v15, 2 }
 0x32f   :  { %5231 = vmatmul.mubr.msk.f32.gmra.mrb[4].mxu1 %vm2205_vm6, %v6868_v14  ;;  %v7287_v26 = vsel %vm527_vm3, %v2960_v49, %v2961_v60  ;;  %v7292_v63 = vsel %vm527_vm3, %v2963_v33, %v2964_v32  ;;  %v2973_v9 = vrot.slane %v6907_v40, 2  ;;  %v2979_v49 = vrot.slane %v6941_v31, 2 }
 0x330   :  { %5233 = vmatprep.mubr.msk.f32.mxu1 %vm2205_vm6, %v6864_v51  ;;  %v7271_v1 = vsel %vm527_vm3, %v2954_v21, %v2955_v35  ;;  %v7303_v21 = vsel %vm527_vm3, %v2969_v28, %v2970_v0  ;;  %v2975_v35 = vrot.slane %v6968_v18, 2  ;;  %v2981_v60 = vrot.slane %v7002_v24, 2  ;;  %v2500_v0 = vld [vmem:[%s7662_s4 + $0x50] sm:$0xff] }
 0x331   :  { %v2984_v32 = vrot.slane %v6989_v23, 2  ;;  %v2985_v31 = vrot.slane %v6993_v58, 2 }
 0x333   :  { %5234 = vmatmul.mubr.msk.f32.gmra.mrb[6].mxu1 %vm2205_vm6, %v6879_v30  ;;  %v7338_v28 = vsel %vm527_vm3, %v2984_v32, %v2985_v31  ;;  %v3523_v32 = vrot.slane %v6913_v2, 2  ;;  %v3527_v31 = vrot.slane %v7028_v48, 2 }
 0x334   :  { %5236 = vmatprep.mubr.msk.f32.mxu1 %vm2205_vm6, %v6875_v47 }
 0x337   :  { %5237 = vmatmul.mubr.msk.f32.gmra.mrb[8].mxu1 %vm2205_vm6, %v6935_v61 }
 0x338   :  { %5239 = vmatprep.mubr.msk.f32.mxu1 %vm2205_vm6, %v7696_v46  ;;  %v2972_v46 = vrot.slane %v6897_v5, 2 }
 0x33a   :  { %v7310_v62 = vsel %vm527_vm3, %v2972_v46, %v2973_v9  ;;  %v3353_v46 = vrot.slane %v6858_v29, 1  ;;  %v3352_v9 = vrot.slane %v6913_v2, 1 }
 0x33b   :  { %5240 = vmatmul.mubr.msk.f32.gmra.mrb[10].mxu1 %vm2205_vm6, %v6921_v15 }
 0x33c   :  { %5242 = vmatprep.mubr.msk.f32.mxu1 %vm2205_vm6, %v6897_v5 }
 0x33f   :  { %5243 = vmatmul.mubr.msk.f32.gmra.mrb[12].mxu1 %vm2205_vm6, %v6968_v18 }
 0x340   :  { %5245 = vmatprep.mubr.msk.f32.mxu1 %vm2205_vm6, %v6951_v8 }
 0x343   :  { %5246 = vmatmul.mubr.msk.f32.gmra.mrb[14].mxu1 %vm2205_vm6, %v7002_v24 }
 0x344   :  { %5248 = vmatprep.mubr.msk.f32.mxu1 %vm2205_vm6, %v6989_v23 }
 0x347   :  { %5249 = vmatmul.mubr.msk.f32.gmra.mrb[16].mxu1 %vm2205_vm6, %v7019_v36 }
 0x348   :  { %5255 = vmatprep.mubr.msk.f32.mxu1 %vm2205_vm6, %v2944_v39  ;;  %v2967_v39 = vrot.slane %v7695_v50, 2 }
 0x34a   :  { %v2968_v50 = vsel %vm527_vm3, %v2966_v55, %v2967_v39  ;;  %v2987_v55 = vrot.slane %v7019_v36, 2 }
 0x34b   :  { %5256 = vmatmul.mubr.msk.f32.vlgmr.msra.gmra.mrb[2].mxu1 %vm2205_vm6, %v7249_v59 }
 0x34c   :  { %5258 = vmatprep.mubr.msk.f32.mxu1 %vm2205_vm6, %v7256_v7  ;;  %5468 = vmatpush3.bf16.msra.mxu1 %v5465_v16  ;;  %v7278_v16 = vsel %vm527_vm3, %v2957_v22, %v2958_v42  ;;  %v2976_v22 = vrot.slane %v6961_v38, 2  ;;  %v2978_v42 = vrot.slane %v6951_v8, 2  ;;  %v2982_v38 = vrot.slane %v7006_v56, 2 }
 0x34d   :  { %5470 = vmatprep.subr.bf16.mxu1 %v7246_v27  ;;  %v2988_v56 = vrot.slane %v7024_v19, 2  ;;  %v2501_v19 = vld [vmem:[%s7662_s4 + $0x58] sm:$0xff] }
 0x34e   :  { %v7317_v40 = vsel %vm527_vm3, %v2975_v35, %v2976_v22  ;;  %v7324_v33 = vsel %vm527_vm3, %v2978_v42, %v2979_v49  ;;  %v7331_v39 = vsel %vm527_vm3, %v2981_v60, %v2982_v38  ;;  %v3355_v35 = vrot.slane %v7043_v44, 1  ;;  %v2504_v42 = vld [vmem:[%s7662_s4 + $0x70] sm:$0xff]  ;;  %v2505_v49 = vld [vmem:[%s7662_s4 + $0x78] sm:$0xff] }
 0x34f   :  { %5259 = vmatmul.mubr.msk.f32.gmra.mrb[4].mxu1 %vm2205_vm6, %v7264_v54  ;;  %v7343_v58 = vsel %vm527_vm3, %v2987_v55, %v2988_v56  ;;  %v3356_v22 = vrot.slane %v7028_v48, 1  ;;  %v5481_v60 = vpack.c.bf16 %v2505_v49, %v2504_v42  ;;  %v3524_v38 = vrot.slane %v6858_v29, 2  ;;  %v2506_v55 = vld [vmem:[%s7662_s4 + $0x80] sm:$0xff]  ;;  %v2507_v56 = vld [vmem:[%s7662_s4 + $0x88] sm:$0xff] }
 0x350   :  { %5261 = vmatprep.mubr.msk.f32.mxu1 %vm2205_vm6, %v7271_v1  ;;  %v3526_v29 = vrot.slane %v7043_v44, 2  ;;  %v5485_v48 = vpack.c.bf16 %v2507_v56, %v2506_v55 }
 0x353   :  { %5262 = vmatmul.mubr.msk.f32.gmra.mrb[6].mxu1 %vm2205_vm6, %v7278_v16 }
 0x354   :  { %5264 = vmatprep.mubr.msk.f32.mxu1 %vm2205_vm6, %v7287_v26 }
 0x357   :  { %5265 = vmatmul.mubr.msk.f32.gmra.mrb[8].mxu1 %vm2205_vm6, %v7292_v63 }
 0x358   :  { %5267 = vmatprep.mubr.msk.f32.mxu1 %vm2205_vm6, %v2968_v50  ;;  %v5473_v50 = vpack.c.bf16 %v2501_v19, %v2500_v0 }
 0x35b   :  { %5268 = vmatmul.mubr.msk.f32.gmra.mrb[10].mxu1 %vm2205_vm6, %v7303_v21 }
 0x35c   :  { %5270 = vmatprep.mubr.msk.f32.mxu1 %vm2205_vm6, %v7310_v62 }
 0x35f   :  { %5271 = vmatmul.mubr.msk.f32.gmra.mrb[12].mxu1 %vm2205_vm6, %v7317_v40 }
 0x360   :  { %5273 = vmatprep.mubr.msk.f32.mxu1 %vm2205_vm6, %v7324_v33 }
 0x363   :  { %5274 = vmatmul.mubr.msk.f32.gmra.mrb[14].mxu1 %vm2205_vm6, %v7331_v39 }
 0x364   :  { %5276 = vmatprep.mubr.msk.f32.mxu1 %vm2205_vm6, %v7338_v28 }
 0x367   :  { %5277 = vmatmul.mubr.msk.f32.gmra.mrb[16].mxu1 %vm2205_vm6, %v7343_v58 }
 0x368   :  { %5283 = vmatprep.mubr.msk.f32.mxu1 %vm2205_vm6, %v6783_v53  ;;  %v2502_v53 = vld [vmem:[%s7662_s4 + $0x60] sm:$0xff] }
 0x36b   :  { %5284 = vmatmul.mubr.msk.f32.vlgmr.msra.gmra.mrb[2].mxu1 %vm2205_vm6, %v7691_v13 }
 0x36c   :  { %5286 = vmatprep.mubr.msk.f32.mxu1 %vm2205_vm6, %v6868_v14  ;;  %5472 = vmatpush3.bf16.msra.mxu1 %v7246_v27 }
 0x36d   :  { %5474 = vmatprep.subr.bf16.mxu1 %v5473_v50 }
 0x36f   :  { %5287 = vmatmul.mubr.msk.f32.gmra.mrb[4].mxu1 %vm2205_vm6, %v6864_v51 }
 0x370   :  { %5289 = vmatprep.mubr.msk.f32.mxu1 %vm2205_vm6, %v6879_v30 }
 0x373   :  { %5290 = vmatmul.mubr.msk.f32.gmra.mrb[6].mxu1 %vm2205_vm6, %v6875_v47 }
 0x374   :  { %5292 = vmatprep.mubr.msk.f32.mxu1 %vm2205_vm6, %v6935_v61 }
 0x377   :  { %5293 = vmatmul.mubr.msk.f32.gmra.mrb[8].mxu1 %vm2205_vm6, %v6913_v2 }
 0x378   :  { %5295 = vmatprep.mubr.msk.f32.mxu1 %vm2205_vm6, %v6921_v15  ;;  %v2503_v15 = vld [vmem:[%s7662_s4 + $0x68] sm:$0xff] }
 0x379   :  { %v5477_v27 = vpack.c.bf16 %v2503_v15, %v2502_v53 }
 0x37b   :  { %5296 = vmatmul.mubr.msk.f32.gmra.mrb[10].mxu1 %vm2205_vm6, %v6897_v5 }
 0x37c   :  { %5298 = vmatprep.mubr.msk.f32.mxu1 %vm2205_vm6, %v6968_v18 }
 0x37f   :  { %5299 = vmatmul.mubr.msk.f32.gmra.mrb[12].mxu1 %vm2205_vm6, %v6951_v8 }
 0x380   :  { %5301 = vmatprep.mubr.msk.f32.mxu1 %vm2205_vm6, %v7002_v24 }
 0x383   :  { %5302 = vmatmul.mubr.msk.f32.gmra.mrb[14].mxu1 %vm2205_vm6, %v6989_v23 }
 0x384   :  { %5304 = vmatprep.mubr.msk.f32.mxu1 %vm2205_vm6, %v7019_v36 }
 0x387   :  { %5305 = vmatmul.mubr.msk.f32.gmra.mrb[16].mxu1 %vm2205_vm6, %v7043_v44 }
 0x388   :  { %5311 = vmatprep.mubr.msk.f32.mxu1 %vm2205_vm6, %v7095_v34  ;;  %v7409_v34 = vsel %vm116_vm1, %v3352_v9, %v3353_v46  ;;  %v4277_v46 = vlaneseq }
 0x38a   :  { %v4278_v42 = vshrl.u32 %v4277_v46, 7 }
 0x38b   :  { %5312 = vmatmul.mubr.msk.f32.vlgmr.msra.gmra.mrb[2].mxu1 %vm2205_vm6, %v7102_v37 }
 0x38c   :  { %5314 = vmatprep.mubr.msk.f32.mxu1 %vm2205_vm6, %v7110_v11  ;;  %5476 = vmatpush3.bf16.msra.mxu1 %v5473_v50  ;;  %v4283_v56 = vsub.s32 1, %v4278_v42 }
 0x38d   :  { %5478 = vmatprep.subr.bf16.mxu1 %v5477_v27 }
 0x38f   :  { %5315 = vmatmul.mubr.msk.f32.gmra.mrb[4].mxu1 %vm2205_vm6, %v7117_v43 }
 0x390   :  { %5317 = vmatprep.mubr.msk.f32.mxu1 %vm2205_vm6, %v7124_v45 }
 0x393   :  { %5318 = vmatmul.mubr.msk.f32.gmra.mrb[6].mxu1 %vm2205_vm6, %v7133_v12 }
 0x394   :  { %5320 = vmatprep.mubr.msk.f32.mxu1 %vm2205_vm6, %v7138_v25 }
 0x397   :  { %5321 = vmatmul.mubr.msk.f32.gmra.mrb[8].mxu1 %vm2205_vm6, %v7409_v34 }
 0x398   :  { %5323 = vmatprep.mubr.msk.f32.mxu1 %vm2205_vm6, %v7149_v4  ;;  %v7430_v4 = vsel %vm116_vm1, %v3355_v35, %v3356_v22 }
 0x39b   :  { %5324 = vmatmul.mubr.msk.f32.gmra.mrb[10].mxu1 %vm2205_vm6, %v7156_v17 }
 0x39c   :  { %5326 = vmatprep.mubr.msk.f32.mxu1 %vm2205_vm6, %v7163_v3 }
 0x39f   :  { %5327 = vmatmul.mubr.msk.f32.gmra.mrb[12].mxu1 %vm2205_vm6, %v7170_v57 }
 0x3a0   :  { %5329 = vmatprep.mubr.msk.f32.mxu1 %vm2205_vm6, %v7177_v41 }
 0x3a3   :  { %5330 = vmatmul.mubr.msk.f32.gmra.mrb[14].mxu1 %vm2205_vm6, %v7184_v6 }
 0x3a4   :  { %5332 = vmatprep.mubr.msk.f32.mxu1 %vm2205_vm6, %v7189_v10 }
 0x3a7   :  { %5333 = vmatmul.mubr.msk.f32.gmra.mrb[16].mxu1 %vm2205_vm6, %v7430_v4 }
 0x3a8   :  { %5339 = vmatprep.mubr.msk.f32.mxu1 %vm2205_vm6, %v7249_v59  ;;  %v7457_v59 = vsel %vm527_vm3, %v3523_v32, %v3524_v38 }
 0x3ab   :  { %5340 = vmatmul.mubr.msk.f32.vlgmr.msra.gmra.mrb[2].mxu1 %vm2205_vm6, %v7256_v7 }
 0x3ac   :  { %5342 = vmatprep.mubr.msk.f32.mxu1 %vm2205_vm6, %v7264_v54  ;;  %5480 = vmatpush3.bf16.msra.mxu1 %v5477_v27  ;;  %v4625_v27 = vld [vmem:[%s7665_s5] ss:$0 sm:$0xff] }
 0x3ad   :  { %5482 = vmatprep.subr.bf16.mxu1 %v5481_v60 }
 0x3af   :  { %5343 = vmatmul.mubr.msk.f32.gmra.mrb[4].mxu1 %vm2205_vm6, %v7271_v1 }
 0x3b0   :  { %5345 = vmatprep.mubr.msk.f32.mxu1 %vm2205_vm6, %v7278_v16 }
 0x3b3   :  { %5346 = vmatmul.mubr.msk.f32.gmra.mrb[6].mxu1 %vm2205_vm6, %v7287_v26 }
 0x3b4   :  { %5348 = vmatprep.mubr.msk.f32.mxu1 %vm2205_vm6, %v7292_v63 }
 0x3b7   :  { %5349 = vmatmul.mubr.msk.f32.gmra.mrb[8].mxu1 %vm2205_vm6, %v7457_v59 }
 0x3b8   :  { %5351 = vmatprep.mubr.msk.f32.mxu1 %vm2205_vm6, %v7303_v21  ;;  %v7478_v21 = vsel %vm527_vm3, %v3526_v29, %v3527_v31  ;;  %v4279_v31 = vsub.s32 0, %v4278_v42 }
 0x3bb   :  { %5352 = vmatmul.mubr.msk.f32.gmra.mrb[10].mxu1 %vm2205_vm6, %v7310_v62 }
 0x3bc   :  { %5354 = vmatprep.mubr.msk.f32.mxu1 %vm2205_vm6, %v7317_v40 }
 0x3bf   :  { %5355 = vmatmul.mubr.msk.f32.gmra.mrb[12].mxu1 %vm2205_vm6, %v7324_v33 }
 0x3c0   :  { %5357 = vmatprep.mubr.msk.f32.mxu1 %vm2205_vm6, %v7331_v39 }
 0x3c3   :  { %5358 = vmatmul.mubr.msk.f32.gmra.mrb[14].mxu1 %vm2205_vm6, %v7338_v28 }
 0x3c4   :  { %5360 = vmatprep.mubr.msk.f32.mxu1 %vm2205_vm6, %v7343_v58 }
 0x3c7   :  { %5361 = vmatmul.mubr.msk.f32.gmra.mrb[16].mxu1 %vm2205_vm6, %v7478_v21 }
 0x3c8   :  { %5367 = vmatprep.mubr.msk.f32.mxu1 %vm2205_vm6, %v7691_v13  ;;  %v7697_v13 = vld [vmem:[#allocation6_spill] sm:$0xff] }
 0x3cb   :  { %5368 = vmatmul.mubr.msk.f32.vlgmr.msra.gmra.mrb[2].mxu1 %vm2205_vm6, %v6868_v14 }
 0x3cc   :  { %5370 = vmatprep.mubr.msk.f32.mxu1 %vm2205_vm6, %v6864_v51  ;;  %5484 = vmatpush3.bf16.msra.mxu1 %v5481_v60  ;;  %v4479_v51 = vld [vmem:[%s7664_s9] ss:$0 sm:$0xff] }
 0x3cd   :  { %5486 = vmatprep.subr.bf16.mxu1 %v5485_v48 }
 0x3cf   :  { %5371 = vmatmul.mubr.msk.f32.gmra.mrb[4].mxu1 %vm2205_vm6, %v6879_v30 }
 0x3d0   :  { %5373 = vmatprep.mubr.msk.f32.mxu1 %vm2205_vm6, %v6875_v47 }
 0x3d3   :  { %5374 = vmatmul.mubr.msk.f32.gmra.mrb[6].mxu1 %vm2205_vm6, %v6935_v61 }
 0x3d4   :  { %5376 = vmatprep.mubr.msk.f32.mxu1 %vm2205_vm6, %v6913_v2  ;;  %v7698_v2 = vld [vmem:[#allocation4_spill] sm:$0xff] }
 0x3d5   :  { %v3864_v61 = vrot.slane %v7698_v2, 1 }
 0x3d7   :  { %5377 = vmatmul.mubr.msk.f32.gmra.mrb[8].mxu1 %vm2205_vm6, %v7697_v13 }
 0x3d8   :  { %5379 = vmatprep.mubr.msk.f32.mxu1 %vm2205_vm6, %v6897_v5 }
 0x3da   :  { %v2469_v14 = vpop.f32.mrb[0].mxu1 }
 0x3db   :  { %v2470_v30 = vadd.f32 %v4479_v51, %v2469_v14  ;;  %v5194_v0 = vpop.f32.mrb[1].mxu1  ;;  %5380 = vmatmul.mubr.msk.f32.gmra.mrb[10].mxu1 %vm2205_vm6, %v6968_v18 }
 0x3dc   :  { %5382 = vmatprep.mubr.msk.f32.mxu1 %vm2205_vm6, %v6951_v8  ;;  %v3863_v8 = vrot.slane %v7697_v13, 1 }
 0x3dd   :  { %v2474_v47 = vmul.f32 1.4285715, %v2470_v30 }
 0x3de   :  { %v3865_v18 = vsel %vm116_vm1, %v3863_v8, %v3864_v61 }
 0x3df   :  { %5383 = vmatmul.mubr.msk.f32.gmra.mrb[12].mxu1 %vm2205_vm6, %v7002_v24  ;;  %v2476_v5 = vsel %vm2475_vm10, %v2474_v47, -inf  ;;  %v3866_v24 = vrot.slane %v7035_v20, 1 }
 0x3e0   :  { %5385 = vmatprep.mubr.msk.f32.mxu1 %vm2205_vm6, %v6989_v23  ;;  %2477 = vmax.xlane.f32.xlu0 %v2476_v5  ;;  %v3867_v23 = vrot.slane %v6821_v52, 1 }
 0x3e3   :  { %5386 = vmatmul.mubr.msk.f32.gmra.mrb[14].mxu1 %vm2205_vm6, %v7019_v36  ;;  %v3868_v36 = vsel %vm116_vm1, %v3866_v24, %v3867_v23 }
 0x3e4   :  { %5388 = vmatprep.mubr.msk.f32.mxu1 %vm2205_vm6, %v7043_v44  ;;  %v4035_v44 = vrot.slane %v7698_v2, 2 }
 0x3e7   :  { %5389 = vmatmul.mubr.msk.f32.gmra.mrb[16].mxu1 %vm2205_vm6, %v7035_v20 }
 0x3e8   :  { %5395 = vmatprep.mubr.msk.f32.mxu1 %vm2205_vm6, %v7102_v37  ;;  %v4034_v37 = vrot.slane %v7697_v13, 2 }
 0x3eb   :  { %5396 = vmatmul.mubr.msk.f32.vlgmr.msra.gmra.mrb[2].mxu1 %vm2205_vm6, %v7110_v11  ;;  %v4036_v11 = vsel %vm527_vm3, %v4034_v37, %v4035_v44 }
 0x3ec   :  { %5398 = vmatprep.mubr.msk.f32.mxu1 %vm2205_vm6, %v7117_v43  ;;  %5488 = vmatpush3.bf16.msra.mxu1 %v5485_v48  ;;  %v4038_v43 = vrot.slane %v6821_v52, 2 }
 0x3ef   :  { %5399 = vmatmul.mubr.msk.f32.gmra.mrb[4].mxu1 %vm2205_vm6, %v7124_v45  ;;  %v4037_v45 = vrot.slane %v7035_v20, 2 }
 0x3f0   :  { %5401 = vmatprep.mubr.msk.f32.mxu1 %vm2205_vm6, %v7133_v12 }
 0x3f1   :  { %v4039_v12 = vsel %vm527_vm3, %v4037_v45, %v4038_v43 }
 0x3f3   :  { %5402 = vmatmul.mubr.msk.f32.gmra.mrb[6].mxu1 %vm2205_vm6, %v7138_v25 }
 0x3f4   :  { %5404 = vmatprep.mubr.msk.f32.mxu1 %vm2205_vm6, %v7409_v34 }
 0x3f7   :  { %5405 = vmatmul.mubr.msk.f32.gmra.mrb[8].mxu1 %vm2205_vm6, %v3865_v18 }
 0x3f8   :  { %5407 = vmatprep.mubr.msk.f32.mxu1 %vm2205_vm6, %v7156_v17 }
 0x3fb   :  { %5408 = vmatmul.mubr.msk.f32.gmra.mrb[10].mxu1 %vm2205_vm6, %v7163_v3 }
 0x3fc   :  { %5410 = vmatprep.mubr.msk.f32.mxu1 %vm2205_vm6, %v7170_v57 }
 0x3ff   :  { %5411 = vmatmul.mubr.msk.f32.gmra.mrb[12].mxu1 %vm2205_vm6, %v7177_v41 }
 0x400   :  { %5413 = vmatprep.mubr.msk.f32.mxu1 %vm2205_vm6, %v7184_v6 }
 0x403   :  { %5414 = vmatmul.mubr.msk.f32.gmra.mrb[14].mxu1 %vm2205_vm6, %v7189_v10 }
 0x404   :  { %5416 = vmatprep.mubr.msk.f32.mxu1 %vm2205_vm6, %v7430_v4 }
 0x407   :  { %5417 = vmatmul.mubr.msk.f32.gmra.mrb[16].mxu1 %vm2205_vm6, %v3868_v36 }
 0x408   :  { %5423 = vmatprep.mubr.msk.f32.mxu1 %vm2205_vm6, %v7256_v7 }
 0x40b   :  { %5424 = vmatmul.mubr.msk.f32.vlgmr.msra.gmra.mrb[2].mxu1 %vm2205_vm6, %v7264_v54 }
 0x40c   :  { %5426 = vmatprep.mubr.msk.f32.mxu1 %vm2205_vm6, %v7271_v1 }
 0x40f   :  { %5427 = vmatmul.mubr.msk.f32.gmra.mrb[4].mxu1 %vm2205_vm6, %v7278_v16 }
 0x410   :  { %5429 = vmatprep.mubr.msk.f32.mxu1 %vm2205_vm6, %v7287_v26 }
 0x413   :  { %5430 = vmatmul.mubr.msk.f32.gmra.mrb[6].mxu1 %vm2205_vm6, %v7292_v63 }
 0x414   :  { %5432 = vmatprep.mubr.msk.f32.mxu1 %vm2205_vm6, %v7457_v59 }
 0x417   :  { %5433 = vmatmul.mubr.msk.f32.gmra.mrb[8].mxu1 %vm2205_vm6, %v4036_v11 }
 0x418   :  { %5435 = vmatprep.mubr.msk.f32.mxu1 %vm2205_vm6, %v7310_v62 }
 0x41b   :  { %5436 = vmatmul.mubr.msk.f32.gmra.mrb[10].mxu1 %vm2205_vm6, %v7317_v40 }
 0x41c   :  { %5438 = vmatprep.mubr.msk.f32.mxu1 %vm2205_vm6, %v7324_v33 }
 0x41f   :  { %5439 = vmatmul.mubr.msk.f32.gmra.mrb[12].mxu1 %vm2205_vm6, %v7331_v39 }
 0x420   :  { %5441 = vmatprep.mubr.msk.f32.mxu1 %vm2205_vm6, %v7338_v28 }
 0x423   :  { %5442 = vmatmul.mubr.msk.f32.gmra.mrb[14].mxu1 %vm2205_vm6, %v7343_v58 }
 0x424   :  { %5444 = vmatprep.mubr.msk.f32.mxu1 %vm2205_vm6, %v7478_v21 }
 0x427   :  { %5445 = vmatmul.mubr.msk.f32.gmra.mrb[16].mxu1 %vm2205_vm6, %v4039_v12 }
 0x46d   :  { %v2478_v25 = vpop.xlane.xlu0 %2477 }
 0x46e   :  { %v2479_v17 = vsub.f32 %v2474_v47, %v2478_v25 }
 0x470   :  { %v2480_v3 = vmul.f32 1.442695, %v2479_v17 }
 0x472   :  { %5749 = vpow2.f32 %v2480_v3 }
 0x47c   :  { %v5750_v57 = vpop.eup %5749 }
 0x47d   :  { %v2482_v41 = vsel %vm2475_vm10, %v5750_v57, 0.0 }
 0x47e   :  { %2483 = vadd.xlane.f32.xlu1 %v2482_v41 }
 0x4de   :  { %v5425_v52 = vpop.f32.mrb[2].mxu1 }
 0x4df   :  { %v4110_v20 = vpop.f32.mrb[3].mxu1  ;;  %v4213_v9 = vadd.f32 %v5425_v52, %v4625_v27 }
 0x4e0   :  { %v4212_v34 = vadd.f32 %v4625_v27, %v4110_v20 }
 0x4e1   :  { %v4245_v49 = vmul.f32 0.01, %v4213_v9  ;;  %vm4229_vm1 = vcmp.ge.f32.partialorder %v4213_v9, 0.0 }
 0x4e2   :  { %v5428_v6 = vpop.f32.mrb[4].mxu1  ;;  %v4244_v60 = vmul.f32 0.01, %v4212_v34  ;;  %vm4228_vm3 = vcmp.ge.f32.partialorder %v4212_v34, 0.0 }
 0x4e3   :  { %v4120_v10 = vpop.f32.mrb[5].mxu1  ;;  %v4215_v35 = vadd.f32 %v5428_v6, %v4625_v27  ;;  %v4261_v21 = vsel %vm4229_vm1, %v4213_v9, %v4245_v49 }
 0x4e4   :  { %v4214_v22 = vadd.f32 %v4625_v27, %v4120_v10  ;;  %v4260_v48 = vsel %vm4228_vm3, %v4212_v34, %v4244_v60 }
 0x4e5   :  { %v4247_v38 = vmul.f32 0.01, %v4215_v35  ;;  %vm4231_vm6 = vcmp.ge.f32.partialorder %v4215_v35, 0.0 }
 0x4e6   :  { %v5431_v7 = vpop.f32.mrb[6].mxu1  ;;  %v4246_v32 = vmul.f32 0.01, %v4214_v22  ;;  %vm4230_vm15 = vcmp.ge.f32.partialorder %v4214_v22, 0.0 }
 0x4e7   :  { %v4130_v54 = vpop.f32.mrb[7].mxu1  ;;  %v4217_v4 = vadd.f32 %v5431_v7, %v4625_v27  ;;  %v4263_v13 = vsel %vm4231_vm6, %v4215_v35, %v4247_v38 }
 0x4e8   :  { %v4216_v59 = vadd.f32 %v4625_v27, %v4130_v54  ;;  %v4262_v30 = vsel %vm4230_vm15, %v4214_v22, %v4246_v32 }
 0x4e9   :  { %v4249_v29 = vmul.f32 0.01, %v4217_v4  ;;  %vm4233_vm0 = vcmp.ge.f32.partialorder %v4217_v4, 0.0 }
 0x4ea   :  { %v5434_v1 = vpop.f32.mrb[8].mxu1  ;;  %vm4232_vm2 = vcmp.ge.f32.partialorder %v4216_v59, 0.0  ;;  %v4248_v2 = vmul.f32 0.01, %v4216_v59 }
 0x4eb   :  { %v4140_v16 = vpop.f32.mrb[9].mxu1  ;;  %v4219_v55 = vadd.f32 %v5434_v1, %v4625_v27  ;;  %v4265_v5 = vsel %vm4233_vm0, %v4217_v4, %v4249_v29 }
 0x4ec   :  { %v4218_v51 = vadd.f32 %v4625_v27, %v4140_v16  ;;  %v4264_v25 = vsel %vm4232_vm2, %v4216_v59, %v4248_v2 }
 0x4ed   :  { %v4251_v18 = vmul.f32 0.01, %v4219_v55  ;;  %vm4235_vm4 = vcmp.ge.f32.partialorder %v4219_v55, 0.0 }
 0x4ee   :  { %v5437_v26 = vpop.f32.mrb[10].mxu1  ;;  %vm4234_vm8 = vcmp.ge.f32.partialorder %v4218_v51, 0.0  ;;  %v4250_v44 = vmul.f32 0.01, %v4218_v51 }
 0x4ef   :  { %v4150_v63 = vpop.f32.mrb[11].mxu1  ;;  %v4221_v14 = vadd.f32 %v5437_v26, %v4625_v27  ;;  %v4267_v41 = vsel %vm4235_vm4, %v4219_v55, %v4251_v18 }
 0x4f0   :  { %v4220_v0 = vadd.f32 %v4625_v27, %v4150_v63  ;;  %v4266_v52 = vsel %vm4234_vm8, %v4218_v51, %v4250_v44 }
 0x4f1   :  { %v4253_v37 = vmul.f32 0.01, %v4221_v14  ;;  %vm4237_vm9 = vcmp.ge.f32.partialorder %v4221_v14, 0.0 }
 0x4f2   :  { %v5440_v62 = vpop.f32.mrb[12].mxu1  ;;  %vm4236_vm11 = vcmp.ge.f32.partialorder %v4220_v0, 0.0  ;;  %v4252_v11 = vmul.f32 0.01, %v4220_v0 }
 0x4f3   :  { %v4160_v40 = vpop.f32.mrb[13].mxu1  ;;  %v4223_v47 = vadd.f32 %v5440_v62, %v4625_v27  ;;  %v4269_v20 = vsel %vm4237_vm9, %v4221_v14, %v4253_v37 }
 0x4f4   :  { %v4222_v61 = vadd.f32 %v4625_v27, %v4160_v40  ;;  %v4268_v6 = vsel %vm4236_vm11, %v4220_v0, %v4252_v11 }
 0x4f5   :  { %v4255_v43 = vmul.f32 0.01, %v4223_v47  ;;  %vm4239_vm12 = vcmp.ge.f32.partialorder %v4223_v47, 0.0 }
 0x4f6   :  { %v5443_v33 = vpop.f32.mrb[14].mxu1  ;;  %vm4238_vm13 = vcmp.ge.f32.partialorder %v4222_v61, 0.0  ;;  %v4254_v45 = vmul.f32 0.01, %v4222_v61 }
 0x4f7   :  { %v4170_v39 = vpop.f32.mrb[15].mxu1  ;;  %v4225_v8 = vadd.f32 %v5443_v33, %v4625_v27  ;;  %v4271_v7 = vsel %vm4239_vm12, %v4223_v47, %v4255_v43 }
 0x4f8   :  { %v4224_v23 = vadd.f32 %v4625_v27, %v4170_v39  ;;  %v4270_v54 = vsel %vm4238_vm13, %v4222_v61, %v4254_v45 }
 0x4f9   :  { %v4257_v12 = vmul.f32 0.01, %v4225_v8  ;;  %vm4241_vm14 = vcmp.ge.f32.partialorder %v4225_v8, 0.0 }
 0x4fa   :  { %v5446_v28 = vpop.f32.mrb[16].mxu1  ;;  %v4256_v17 = vmul.f32 0.01, %v4224_v23  ;;  %vm4240_vm5 = vcmp.ge.f32.partialorder %v4224_v23, 0.0 }
 0x4fb   :  { %v4180_v58 = vpop.f32.mrb[17].mxu1  ;;  %v4227_v24 = vadd.f32 %v5446_v28, %v4625_v27  ;;  %v4273_v26 = vsel %vm4241_vm14, %v4225_v8, %v4257_v12 }
 0x4fc   :  { %v4226_v36 = vadd.f32 %v4625_v27, %v4180_v58  ;;  %v4272_v63 = vsel %vm4240_vm5, %v4224_v23, %v4256_v17 }
 0x4fd   :  { %v4259_v3 = vmul.f32 0.01, %v4227_v24  ;;  %vm4243_vm7 = vcmp.ge.f32.partialorder %v4227_v24, 0.0 }
 0x4ff   :  { %v4275_v62 = vsel %vm4243_vm7, %v4227_v24, %v4259_v3 }
 0x50b   :  { %v2484_v19 = vpop.xlane.xlu1 %2483 }
 0x50c   :  { %5751 = vrcp.f32 %v2484_v19 }
 0x516   :  { %v5752_v50 = vpop.eup %5751 }
 0x517   :  { %v2486_v53 = vmul.f32 %v5752_v50, %v5750_v57  ;;  %v4258_v57 = vmul.f32 0.01, %v4226_v36 }
 0x519   :  { %v2487_v15 = vsel %vm2475_vm10, %v2486_v53, 0.0  ;;  %vm4242_vm10 = vcmp.ge.f32.partialorder %v4226_v36, 0.0 }
 0x51a   :  { %2488 = vadd.xlane.f32.xlu0 %v2487_v15  ;;  %v4274_v40 = vsel %vm4242_vm10, %v4226_v36, %v4258_v57 }
 0x5a7   :  { %v2489_v10 = vpop.xlane.xlu0 %2488 }
 0x5a8   :  { %v4280_v1 = vrot.slane %v2489_v10, %v4279_v31  ;;  %v4284_v16 = vrot.slane %v2489_v10, %v4283_v56 }
 0x5aa   :  { %v4287_v33 = vmul.f32 %v4280_v1, %v4260_v48  ;;  %v4288_v39 = vmul.f32 %v4280_v1, %v4261_v21  ;;  %v4289_v28 = vmul.f32 %v4280_v1, %v4262_v30  ;;  %v4290_v58 = vmul.f32 %v4280_v1, %v4263_v13 }
 0x5ab   :  { %v4291_v19 = vmul.f32 %v4280_v1, %v4264_v25  ;;  %v4292_v50 = vmul.f32 %v4280_v1, %v4265_v5  ;;  %v4293_v53 = vmul.f32 %v4280_v1, %v4266_v52  ;;  %v4294_v15 = vmul.f32 %v4280_v1, %v4267_v41 }
 0x5ac   :  { %v4295_v27 = vmul.f32 %v4284_v16, %v4268_v6  ;;  %v4296_v46 = vmul.f32 %v4284_v16, %v4269_v20  ;;  %v4297_v9 = vmul.f32 %v4284_v16, %v4270_v54  ;;  %v4298_v34 = vmul.f32 %v4284_v16, %v4271_v7  ;;  %4303 = vst [vmem:[%s7666_s10] sm:$0xff] %v4287_v33 }
 0x5ad   :  { %4304 = vst [vmem:[%s7666_s10 + $0x8] sm:$0xff] %v4288_v39  ;;  %4305 = vst [vmem:[%s7666_s10 + $0x10] sm:$0xff] %v4289_v28  ;;  %v4299_v35 = vmul.f32 %v4284_v16, %v4272_v63  ;;  %v4300_v22 = vmul.f32 %v4284_v16, %v4273_v26  ;;  %v4301_v4 = vmul.f32 %v4284_v16, %v4274_v40 }
 0x5ae   :  { %4306 = vst [vmem:[%s7666_s10 + $0x18] sm:$0xff] %v4290_v58  ;;  %v4302_v42 = vmul.f32 %v4284_v16, %v4275_v62  ;;  %4307 = vst [vmem:[%s7666_s10 + $0x20] sm:$0xff] %v4291_v19 }
 0x5af   :  { %4308 = vst [vmem:[%s7666_s10 + $0x28] sm:$0xff] %v4292_v50  ;;  %4309 = vst [vmem:[%s7666_s10 + $0x30] sm:$0xff] %v4293_v53 }
 0x5b0   :  { %4310 = vst [vmem:[%s7666_s10 + $0x38] sm:$0xff] %v4294_v15  ;;  %4311 = vst [vmem:[%s7666_s10 + $0x40] sm:$0xff] %v4295_v27 }
 0x5b1   :  { %4312 = vst [vmem:[%s7666_s10 + $0x48] sm:$0xff] %v4296_v46  ;;  %4313 = vst [vmem:[%s7666_s10 + $0x50] sm:$0xff] %v4297_v9 }
 0x5b2   :  { %4314 = vst [vmem:[%s7666_s10 + $0x58] sm:$0xff] %v4298_v34  ;;  %4315 = vst [vmem:[%s7666_s10 + $0x60] sm:$0xff] %v4299_v35 }
 0x5b3   :  { %4316 = vst [vmem:[%s7666_s10 + $0x68] sm:$0xff] %v4300_v22  ;;  %4317 = vst [vmem:[%s7666_s10 + $0x70] sm:$0xff] %v4301_v4 }
 0x5b4   :  { %4318 = vst [vmem:[%s7666_s10 + $0x78] sm:$0xff] %v4302_v42 }

</bundles_post_ra>
